<compile_context>
chip_gen: v6e
topology: v6e:2x2x1
jax: 0.10.0
libtpu: 0.0.40
codegen_flags: <defaults>
</compile_context>

<pallas_src>
import numpy as np
import jax
import jax.numpy as jnp
from jax.experimental import pallas as pl
from jax.experimental.pallas import tpu as pltpu

# ----------------------- static problem sizes (small, synthetic) ------------
N_POI = 32                 # number of POIs (graph nodes)
EMBED_DIM = 32             # embedding dim D
GCN_NUM = 2                # number of Geo_GCN layers (hard-fused below)
SECTIONS = (3, 8, 2, 3)    # nodes per session (data.batch bincount, static)
BATCH = len(SECTIONS)
MAX_LEN = 8                # max(SECTIONS), sublane aligned
B_PAD = 8                  # batch padded to a full sublane tile
TOTAL_NODES = sum(SECTIONS)
N_EDGES = 48               # synthetic dist_edges count (before symmetrize+loops)
OUT_LANES = 128            # lane-dense output slab width
D = EMBED_DIM
G_ROWS = 80                # B_PAD + B_PAD*MAX_LEN = 72, padded to bf16 tile (16)
W_SLAB_LANES = 256         # 7 * D = 224 weight lanes, padded to 2 lane tiles

VMEM_SPEC = pl.BlockSpec(memory_space=pltpu.MemorySpace.VMEM)


# ----------------------------- Pallas kernel ---------------------------------
def _leaky(x):
    return jnp.where(x >= 0, x, 0.01 * x)          # F.leaky_relu, slope 0.01


def _l2norm(h):
    inv = jax.lax.rsqrt(jnp.maximum(jnp.sum(h * h, axis=-1, keepdims=True), 1e-24))
    return h * inv                                  # F.normalize(dim=-1)


def _fused_forward_kernel(wslab_ref, p1h1_ref, g1h_ref, misc_ref, out_ref):
    """Entire GeoGraph.forward in one kernel.

    wslab: [32, 256] bf16  lane-packed: qw|kw|adj|(emb@W0)|W1|vw|h2w|pad
    p1h1:  [96, 64]  bf16  block-diag: [p1w 0; 0 h1w]
    g1h:   [80, 32]  bf16  fused one-hot gather (rows 0..7 poi, 8..71 pad_sequence)
    misc:  [16, 128] f32   mask_bias/inv_len rows 0..7; biases rows 8..10
    out:   [8, 128]  f32   proj in lanes 0..D-1, logit broadcast in D..2D-1
    """
    f32, bf16 = jnp.float32, jnp.bfloat16

    # --- static slices of the packed operands (zero-cost ref views) ---
    qkw = wslab_ref[:, 0:2 * D]            # [32, 64]  Q | K weights
    adj = wslab_ref[:, 2 * D:3 * D]        # [32, 32]  dense normalized adjacency
    xw0 = wslab_ref[:, 3 * D:4 * D]        # [32, 32]  emb @ W0 (hoisted to glue)
    w1  = wslab_ref[:, 4 * D:5 * D]        # GCN layer-1 weight
    vw  = wslab_ref[:, 5 * D:6 * D]        # HardAttn.V
    h2w = wslab_ref[:, 6 * D:7 * D]        # proj_head[2]

    mask_bias = misc_ref[0:B_PAD, 0:MAX_LEN]              # [8, 8] (0 / -1e9)
    inv_lens  = misc_ref[0:B_PAD, MAX_LEN:MAX_LEN + 1]    # [8, 1]
    gb0 = misc_ref[8:9, 0:D]
    gb1 = misc_ref[8:9, D:2 * D]
    vb  = misc_ref[8:9, 2 * D:3 * D]
    h2b = misc_ref[8:9, 3 * D:4 * D]
    qkb   = misc_ref[9:10, 0:2 * D]                       # qb | kb
    p1h1b = misc_ref[9:10, 2 * D:4 * D]                   # p1b | h1b
    p2w_row = misc_ref[10:11, 0:D]
    p2b     = misc_ref[10:11, D:D + 1]

    # --- GCN layer 0: leaky(A @ (X @ W0) + b0), L2-normalize (reassociated) ---
    h = jnp.dot(adj, xw0, preferred_element_type=f32) + gb0
    enc = _l2norm(_leaky(h))

    # --- GCN layer 1: leaky((A @ enc) @ W1 + b1), L2-normalize ---
    side = jnp.dot(adj, enc.astype(bf16), preferred_element_type=f32)
    h = jnp.dot(side.astype(bf16), w1, preferred_element_type=f32) + gb1
    enc = _l2norm(_leaky(h))

    # --- fused one-hot gather: rows 0..7 = enc[poi], rows 8..71 = padded enc[x] ---
    gath = jnp.dot(g1h_ref[...], enc.astype(bf16), preferred_element_type=f32)  # [80, 32]
    tar = gath[0:B_PAD, :]                                        # [8, 32]
    vpad_flat = gath[B_PAD:B_PAD + B_PAD * MAX_LEN, :]            # [64, 32]

    # --- HardAttn: K and Q in ONE MXU push (shared gathered LHS) ---
    qk = jnp.dot(gath.astype(bf16), qkw, preferred_element_type=f32) + qkb      # [80, 64]
    q = qk[0:B_PAD, 0:D]                                          # Q(tar)   [8, 32]
    vk = qk[B_PAD:B_PAD + B_PAD * MAX_LEN, D:2 * D].reshape(B_PAD, MAX_LEN, D)  # K(pad)

    attn = jnp.sum(vk * q[:, None, :], axis=-1) + mask_bias       # additive mask
    attn = attn - jnp.max(attn, axis=-1, keepdims=True)
    e = jnp.exp(attn)
    attn = e * pl.reciprocal(jnp.sum(e, axis=-1, keepdims=True), approx=True)
    seq_feat = jnp.sum(vk * attn[:, :, None], axis=1)             # [8, 32]
    aggr = jnp.dot(seq_feat.astype(bf16), vw, preferred_element_type=f32) + vb

    # --- split_mean (masked mean via precomputed 1/len) ---
    mean_feat = jnp.sum(vpad_flat.reshape(B_PAD, MAX_LEN, D), axis=1) * inv_lens

    # --- predictor[0] + proj_head[0] as ONE block-diagonal MXU push ---
    fused_in = jnp.concatenate([aggr, tar, mean_feat], axis=-1)   # [8, 96]
    fused = _leaky(jnp.dot(fused_in.astype(bf16), p1h1_ref[...],
                           preferred_element_type=f32) + p1h1b)   # [8, 64]
    ph = fused[:, 0:D]                                            # predictor hidden
    g = fused[:, D:2 * D]                                         # proj_head hidden

    # predictor[2]: [D -> 1] on the VPU (lane mul + reduce), no MXU push
    logit = jnp.sum(ph * p2w_row, axis=-1, keepdims=True) + p2b   # [8, 1]
    proj = jnp.dot(g.astype(bf16), h2w, preferred_element_type=f32) + h2b  # [8, 32]

    # --- full (8,128) output tile: unmasked zero store + lane-sliced writes ---
    out_ref[...] = jnp.zeros((B_PAD, OUT_LANES), f32)
    out_ref[:, 0:D] = proj
    out_ref[:, D:2 * D] = jnp.broadcast_to(logit, (B_PAD, D))


# ------------------------------- JAX glue ------------------------------------
def build_dense_adjacency(dist_edges, dist_vec, n_poi):
    """GeoGraph.__init__ edge setup + Geo_GCN normalization, densified."""
    loop_index = jnp.arange(n_poi, dtype=jnp.int32)
    row = jnp.concatenate([dist_edges[0], dist_edges[1], loop_index])
    col = jnp.concatenate([dist_edges[1], dist_edges[0], loop_index])
    dvec = jnp.concatenate([dist_vec, dist_vec, jnp.zeros((n_poi,), jnp.float32)])

    deg = jnp.zeros((n_poi,), jnp.float32).at[col].add(1.0)     # degree(col)
    deg_inv_sqrt = jnp.where(deg > 0, deg ** -0.5, 0.0)
    norm = deg_inv_sqrt[row] * deg_inv_sqrt[col]
    vals = jnp.exp(-dvec ** 2) * norm
    adj = jnp.zeros((n_poi, n_poi), jnp.float32).at[row, col].add(vals)
    return adj


def make_linear(key, fan_in, fan_out):
    """Deterministic xavier-normal weight [in, out] + small uniform bias [1, out]."""
    kw, kb = jax.random.split(key)
    std = (2.0 / (fan_in + fan_out)) ** 0.5
    w = std * jax.random.normal(kw, (fan_in, fan_out), jnp.float32)
    bound = 1.0 / (fan_in ** 0.5)
    b = jax.random.uniform(kb, (1, fan_out), jnp.float32, -bound, bound)
    return w, b


def geograph_forward(adj, embed_weight, x_idx, poi_idx, params):
    gcn_w, gcn_b, head = params
    (kw, kb, qw, qb, vw, vb,
     p1w, p1b, p2w, p2b,
     h1w, h1b, h2w, h2b) = head

    # --- static pad_sequence / sequence_mask bookkeeping (sections are static) ---
    secs = np.asarray(SECTIONS, np.int64)
    offsets = np.concatenate([[0], np.cumsum(secs)[:-1]]).astype(np.int32)
    valid = np.zeros((B_PAD, MAX_LEN), np.float32)
    valid[:BATCH] = (np.arange(MAX_LEN)[None, :] < secs[:, None]).astype(np.float32)
    mask_bias = (1.0 - valid) * (-1.0e9)                       # additive attention mask
    inv_lens = np.ones((B_PAD, 1), np.float32)
    inv_lens[:BATCH, 0] = 1.0 / secs.astype(np.float32)
    gather_idx = np.zeros((B_PAD, MAX_LEN), np.int32)
    gather_idx[:BATCH] = np.minimum(
        offsets[:, None] + np.arange(MAX_LEN)[None, :], TOTAL_NODES - 1)

    # --- fused one-hot gather slab (index-only glue; enc never leaves the kernel) ---
    pad_nodes = x_idx[jnp.asarray(gather_idx)]                              # [8, 8]
    pad1h = (jax.nn.one_hot(pad_nodes, N_POI, dtype=jnp.float32)
             * jnp.asarray(valid)[:, :, None]).reshape(B_PAD * MAX_LEN, N_POI)
    tar1h = jnp.zeros((B_PAD, N_POI), jnp.float32).at[:BATCH].set(
        jax.nn.one_hot(poi_idx, N_POI, dtype=jnp.float32))
    g1h = (jnp.zeros((G_ROWS, N_POI), jnp.float32)
           .at[:B_PAD].set(tar1h)
           .at[B_PAD:B_PAD + B_PAD * MAX_LEN].set(pad1h)).astype(jnp.bfloat16)

    # --- hoist GCN layer-0 X @ W0, pack all bf16 MXU operands into ONE slab ---
    xw0 = embed_weight @ gcn_w[0]
    wslab = jnp.concatenate(
        [qw, kw, adj, xw0, gcn_w[1], vw, h2w,
         jnp.zeros((D, W_SLAB_LANES - 7 * D), jnp.float32)],
        axis=1).astype(jnp.bfloat16)                                       # [32, 256]

    # --- block-diagonal predictor[0] / proj_head[0] weight ---
    p1h1 = (jnp.zeros((3 * D, 2 * D), jnp.float32)
            .at[0:2 * D, 0:D].set(p1w)
            .at[2 * D:3 * D, D:2 * D].set(h1w)).astype(jnp.bfloat16)       # [96, 64]

    # --- f32 misc slab: attention mask, 1/len, every bias row, predictor[2] ---
    misc = jnp.zeros((16, 128), jnp.float32)
    misc = misc.at[0:B_PAD, 0:MAX_LEN].set(jnp.asarray(mask_bias))
    misc = misc.at[0:B_PAD, MAX_LEN:MAX_LEN + 1].set(jnp.asarray(inv_lens))
    misc = misc.at[8, 0:D].set(gcn_b[0, 0])
    misc = misc.at[8, D:2 * D].set(gcn_b[1, 0])
    misc = misc.at[8, 2 * D:3 * D].set(vb[0])
    misc = misc.at[8, 3 * D:4 * D].set(h2b[0])
    misc = misc.at[9, 0:D].set(qb[0])
    misc = misc.at[9, D:2 * D].set(kb[0])
    misc = misc.at[9, 2 * D:3 * D].set(p1b[0])
    misc = misc.at[9, 3 * D:4 * D].set(h1b[0])
    misc = misc.at[10, 0:D].set(p2w[:, 0])
    misc = misc.at[10, D].set(p2b[0, 0])

    slab = pl.pallas_call(
        _fused_forward_kernel,
        out_shape=jax.ShapeDtypeStruct((B_PAD, OUT_LANES), jnp.float32),
        in_specs=[VMEM_SPEC] * 4,
        out_specs=VMEM_SPEC,
    )(wslab, p1h1, g1h, misc)

    proj_out = slab[:BATCH, :D]                    # proj_head output
    pred_logits = slab[:BATCH, D:D + 1]            # predictor logit
    return proj_out, pred_logits


geograph_forward_jit = jax.jit(geograph_forward)


# ---------------------------------- main -------------------------------------
if __name__ == "__main__":
    root = jax.random.PRNGKey(0)
    keys = jax.random.split(root, 16)

    # synthetic graph / data (deterministic)
    dist_edges = jax.random.randint(keys[0], (2, N_EDGES), 0, N_POI, jnp.int32)
    dist_vec = jax.random.uniform(keys[1], (N_EDGES,), jnp.float32)
    embed_weight = jax.random.normal(keys[2], (N_POI, EMBED_DIM), jnp.float32)
    x_idx = jax.random.randint(keys[3], (TOTAL_NODES,), 0, N_POI, jnp.int32)
    poi_idx = jax.random.randint(keys[4], (BATCH,), 0, N_POI, jnp.int32)

    # parameters (deterministic, module-shape faithful, stored as [in, out])
    gcn_ws, gcn_bs = [], []
    gkeys = jax.random.split(keys[5], GCN_NUM)
    for i in range(GCN_NUM):
        w, b = make_linear(gkeys[i], EMBED_DIM, EMBED_DIM)
        gcn_ws.append(w); gcn_bs.append(b)
    gcn_w = jnp.stack(gcn_ws)                       # [GCN_NUM, D, D]
    gcn_b = jnp.stack(gcn_bs)                       # [GCN_NUM, 1, D]

    kw, kb = make_linear(keys[6], EMBED_DIM, EMBED_DIM)        # HardAttn.K
    qw, qb = make_linear(keys[7], EMBED_DIM, EMBED_DIM)        # HardAttn.Q
    vw, vb = make_linear(keys[8], EMBED_DIM, EMBED_DIM)        # HardAttn.V

    p1w, p1b = make_linear(keys[9], 2 * EMBED_DIM, EMBED_DIM)  # predictor[0]
    p2w, p2b = make_linear(keys[10], EMBED_DIM, 1)             # predictor[2]
    h1w, h1b = make_linear(keys[11], EMBED_DIM, EMBED_DIM)     # proj_head[0]
    h2w, h2b = make_linear(keys[12], EMBED_DIM, EMBED_DIM)     # proj_head[2]

    head_params = (kw, kb, qw, qb, vw, vb,
                   p1w, p1b, p2w, p2b,
                   h1w, h1b, h2w, h2b)
    params = (gcn_w, gcn_b, head_params)

    adj = build_dense_adjacency(dist_edges, dist_vec, N_POI)

    proj_out, pred_logits = geograph_forward_jit(adj, embed_weight, x_idx,
                                                 poi_idx, params)
    proj_out = jax.block_until_ready(proj_out)
    pred_logits = jax.block_until_ready(pred_logits)

    assert proj_out.shape == (BATCH, EMBED_DIM)
    assert pred_logits.shape == (BATCH, 1)
    assert bool(jnp.all(jnp.isfinite(proj_out)))
    assert bool(jnp.all(jnp.isfinite(pred_logits)))
    print("KERNEL_OK")
</pallas_src>

<mosaic_0001>
module attributes {stable_mosaic.version = 11 : i64} {
  func.func @_fused_forward_kernel(%arg0: memref<32x256xbf16, #tpu.memory_space<vmem>>, %arg1: memref<96x64xbf16, #tpu.memory_space<vmem>>, %arg2: memref<80x32xbf16, #tpu.memory_space<vmem>>, %arg3: memref<16x128xf32, #tpu.memory_space<vmem>>, %arg4: memref<8x128xf32, #tpu.memory_space<vmem>>) attributes {dimension_semantics = [], scalar_prefetch = 0 : i64, scratch_operands = 0 : i64, tpu.core_type = #tpu.core_type<tc>} {
    %c0 = arith.constant 0 : index
    %c0_0 = arith.constant 0 : index
    %0 = vector.load %arg0[%c0, %c0_0] : memref<32x256xbf16, #tpu.memory_space<vmem>>, vector<32x64xbf16>
    %c0_1 = arith.constant 0 : index
    %c64 = arith.constant 64 : index
    %1 = vector.load %arg0[%c0_1, %c64] : memref<32x256xbf16, #tpu.memory_space<vmem>>, vector<32x32xbf16>
    %c0_2 = arith.constant 0 : index
    %c96 = arith.constant 96 : index
    %2 = vector.load %arg0[%c0_2, %c96] : memref<32x256xbf16, #tpu.memory_space<vmem>>, vector<32x32xbf16>
    %c0_3 = arith.constant 0 : index
    %c128 = arith.constant 128 : index
    %3 = vector.load %arg0[%c0_3, %c128] : memref<32x256xbf16, #tpu.memory_space<vmem>>, vector<32x32xbf16>
    %c0_4 = arith.constant 0 : index
    %c160 = arith.constant 160 : index
    %4 = vector.load %arg0[%c0_4, %c160] : memref<32x256xbf16, #tpu.memory_space<vmem>>, vector<32x32xbf16>
    %c0_5 = arith.constant 0 : index
    %c192 = arith.constant 192 : index
    %5 = vector.load %arg0[%c0_5, %c192] : memref<32x256xbf16, #tpu.memory_space<vmem>>, vector<32x32xbf16>
    %c0_6 = arith.constant 0 : index
    %c0_7 = arith.constant 0 : index
    %6 = vector.load %arg3[%c0_6, %c0_7] : memref<16x128xf32, #tpu.memory_space<vmem>>, vector<8x8xf32>
    %c0_8 = arith.constant 0 : index
    %c8 = arith.constant 8 : index
    %7 = vector.load %arg3[%c0_8, %c8] : memref<16x128xf32, #tpu.memory_space<vmem>>, vector<8x1xf32>
    %c8_9 = arith.constant 8 : index
    %c0_10 = arith.constant 0 : index
    %8 = vector.load %arg3[%c8_9, %c0_10] : memref<16x128xf32, #tpu.memory_space<vmem>>, vector<1x32xf32>
    %c8_11 = arith.constant 8 : index
    %c32 = arith.constant 32 : index
    %9 = vector.load %arg3[%c8_11, %c32] : memref<16x128xf32, #tpu.memory_space<vmem>>, vector<1x32xf32>
    %c8_12 = arith.constant 8 : index
    %c64_13 = arith.constant 64 : index
    %10 = vector.load %arg3[%c8_12, %c64_13] : memref<16x128xf32, #tpu.memory_space<vmem>>, vector<1x32xf32>
    %c8_14 = arith.constant 8 : index
    %c96_15 = arith.constant 96 : index
    %11 = vector.load %arg3[%c8_14, %c96_15] : memref<16x128xf32, #tpu.memory_space<vmem>>, vector<1x32xf32>
    %c9 = arith.constant 9 : index
    %c0_16 = arith.constant 0 : index
    %12 = vector.load %arg3[%c9, %c0_16] : memref<16x128xf32, #tpu.memory_space<vmem>>, vector<1x64xf32>
    %c9_17 = arith.constant 9 : index
    %c64_18 = arith.constant 64 : index
    %13 = vector.load %arg3[%c9_17, %c64_18] : memref<16x128xf32, #tpu.memory_space<vmem>>, vector<1x64xf32>
    %c10 = arith.constant 10 : index
    %c0_19 = arith.constant 0 : index
    %14 = vector.load %arg3[%c10, %c0_19] : memref<16x128xf32, #tpu.memory_space<vmem>>, vector<1x32xf32>
    %c10_20 = arith.constant 10 : index
    %c32_21 = arith.constant 32 : index
    %15 = vector.load %arg3[%c10_20, %c32_21] : memref<16x128xf32, #tpu.memory_space<vmem>>, vector<1x1xf32>
    %cst = arith.constant dense<0.000000e+00> : vector<32x32xf32>
    %16 = tpu.matmul %1, %2, %cst {dimension_numbers = #tpu.dot_dimension_numbers<[1], [0], [0], [1], [0, 0, 1, 1], [], []>} : vector<32x32xbf16>, vector<32x32xbf16>, vector<32x32xf32> -> vector<32x32xf32>
    %17 = vector.broadcast %8 : vector<1x32xf32> to vector<32x32xf32>
    %18 = arith.addf %16, %17 : vector<32x32xf32>
    %cst_22 = arith.constant 0.000000e+00 : f32
    %19 = vector.broadcast %cst_22 : f32 to vector<32x32xf32>
    %20 = arith.cmpf oge, %18, %19 : vector<32x32xf32>
    %cst_23 = arith.constant 0.00999999977 : f32
    %21 = vector.broadcast %cst_23 : f32 to vector<32x32xf32>
    %22 = arith.mulf %21, %18 : vector<32x32xf32>
    %23 = arith.select %20, %18, %22 : vector<32x32xi1>, vector<32x32xf32>
    %24 = arith.mulf %23, %23 : vector<32x32xf32>
    %cst_24 = arith.constant dense<0.000000e+00> : vector<32xf32>
    %25 = vector.multi_reduction <add>, %24, %cst_24 [1] : vector<32x32xf32> to vector<32xf32>
    %26 = vector.shape_cast %25 : vector<32xf32> to vector<32x1xf32>
    %cst_25 = arith.constant 1.000000e-24 : f32
    %27 = vector.broadcast %cst_25 : f32 to vector<32x1xf32>
    %28 = arith.maximumf %26, %27 : vector<32x1xf32>
    %29 = math.rsqrt %28 : vector<32x1xf32>
    %30 = vector.broadcast %29 : vector<32x1xf32> to vector<32x32xf32>
    %31 = arith.mulf %23, %30 : vector<32x32xf32>
    %32 = arith.truncf %31 : vector<32x32xf32> to vector<32x32xbf16>
    %cst_26 = arith.constant dense<0.000000e+00> : vector<32x32xf32>
    %33 = tpu.matmul %1, %32, %cst_26 {dimension_numbers = #tpu.dot_dimension_numbers<[1], [0], [0], [1], [0, 0, 1, 1], [], []>} : vector<32x32xbf16>, vector<32x32xbf16>, vector<32x32xf32> -> vector<32x32xf32>
    %34 = arith.truncf %33 : vector<32x32xf32> to vector<32x32xbf16>
    %cst_27 = arith.constant dense<0.000000e+00> : vector<32x32xf32>
    %35 = tpu.matmul %34, %3, %cst_27 {dimension_numbers = #tpu.dot_dimension_numbers<[1], [0], [0], [1], [0, 0, 1, 1], [], []>} : vector<32x32xbf16>, vector<32x32xbf16>, vector<32x32xf32> -> vector<32x32xf32>
    %36 = vector.broadcast %9 : vector<1x32xf32> to vector<32x32xf32>
    %37 = arith.addf %35, %36 : vector<32x32xf32>
    %cst_28 = arith.constant 0.000000e+00 : f32
    %38 = vector.broadcast %cst_28 : f32 to vector<32x32xf32>
    %39 = arith.cmpf oge, %37, %38 : vector<32x32xf32>
    %cst_29 = arith.constant 0.00999999977 : f32
    %40 = vector.broadcast %cst_29 : f32 to vector<32x32xf32>
    %41 = arith.mulf %40, %37 : vector<32x32xf32>
    %42 = arith.select %39, %37, %41 : vector<32x32xi1>, vector<32x32xf32>
    %43 = arith.mulf %42, %42 : vector<32x32xf32>
    %cst_30 = arith.constant dense<0.000000e+00> : vector<32xf32>
    %44 = vector.multi_reduction <add>, %43, %cst_30 [1] : vector<32x32xf32> to vector<32xf32>
    %45 = vector.shape_cast %44 : vector<32xf32> to vector<32x1xf32>
    %cst_31 = arith.constant 1.000000e-24 : f32
    %46 = vector.broadcast %cst_31 : f32 to vector<32x1xf32>
    %47 = arith.maximumf %45, %46 : vector<32x1xf32>
    %48 = math.rsqrt %47 : vector<32x1xf32>
    %49 = vector.broadcast %48 : vector<32x1xf32> to vector<32x32xf32>
    %50 = arith.mulf %42, %49 : vector<32x32xf32>
    %c0_32 = arith.constant 0 : index
    %c0_33 = arith.constant 0 : index
    %51 = vector.load %arg2[%c0_32, %c0_33] : memref<80x32xbf16, #tpu.memory_space<vmem>>, vector<80x32xbf16>
    %52 = arith.truncf %50 : vector<32x32xf32> to vector<32x32xbf16>
    %cst_34 = arith.constant dense<0.000000e+00> : vector<80x32xf32>
    %53 = tpu.matmul %51, %52, %cst_34 {dimension_numbers = #tpu.dot_dimension_numbers<[1], [0], [0], [1], [0, 0, 1, 1], [], []>} : vector<80x32xbf16>, vector<32x32xbf16>, vector<80x32xf32> -> vector<80x32xf32>
    %54 = vector.extract_strided_slice %53 {offsets = [0, 0], sizes = [8, 32], strides = [1, 1]} : vector<80x32xf32> to vector<8x32xf32>
    %55 = vector.extract_strided_slice %53 {offsets = [8, 0], sizes = [64, 32], strides = [1, 1]} : vector<80x32xf32> to vector<64x32xf32>
    %56 = arith.truncf %53 : vector<80x32xf32> to vector<80x32xbf16>
    %cst_35 = arith.constant dense<0.000000e+00> : vector<80x64xf32>
    %57 = tpu.matmul %56, %0, %cst_35 {dimension_numbers = #tpu.dot_dimension_numbers<[1], [0], [0], [1], [0, 0, 1, 1], [], []>} : vector<80x32xbf16>, vector<32x64xbf16>, vector<80x64xf32> -> vector<80x64xf32>
    %58 = vector.broadcast %12 : vector<1x64xf32> to vector<80x64xf32>
    %59 = arith.addf %57, %58 : vector<80x64xf32>
    %60 = vector.extract_strided_slice %59 {offsets = [0, 0], sizes = [8, 32], strides = [1, 1]} : vector<80x64xf32> to vector<8x32xf32>
    %61 = vector.extract_strided_slice %59 {offsets = [8, 32], sizes = [64, 32], strides = [1, 1]} : vector<80x64xf32> to vector<64x32xf32>
    %62 = vector.shape_cast %61 : vector<64x32xf32> to vector<8x8x32xf32>
    %63 = vector.shape_cast %60 : vector<8x32xf32> to vector<8x1x32xf32>
    %64 = vector.broadcast %63 : vector<8x1x32xf32> to vector<8x8x32xf32>
    %65 = arith.mulf %62, %64 : vector<8x8x32xf32>
    %cst_36 = arith.constant dense<0.000000e+00> : vector<8x8xf32>
    %66 = vector.multi_reduction <add>, %65, %cst_36 [2] : vector<8x8x32xf32> to vector<8x8xf32>
    %67 = arith.addf %66, %6 : vector<8x8xf32>
    %cst_37 = arith.constant dense<0xFF800000> : vector<8xf32>
    %68 = vector.multi_reduction <maximumf>, %67, %cst_37 [1] : vector<8x8xf32> to vector<8xf32>
    %69 = vector.shape_cast %68 : vector<8xf32> to vector<8x1xf32>
    %70 = vector.broadcast %69 : vector<8x1xf32> to vector<8x8xf32>
    %71 = arith.subf %67, %70 : vector<8x8xf32>
    %72 = math.exp %71 : vector<8x8xf32>
    %cst_38 = arith.constant dense<0.000000e+00> : vector<8xf32>
    %73 = vector.multi_reduction <add>, %72, %cst_38 [1] : vector<8x8xf32> to vector<8xf32>
    %74 = vector.shape_cast %73 : vector<8xf32> to vector<8x1xf32>
    %75 = tpu.reciprocal %74 {approx = true} : vector<8x1xf32> -> vector<8x1xf32>
    %76 = vector.broadcast %75 : vector<8x1xf32> to vector<8x8xf32>
    %77 = arith.mulf %72, %76 : vector<8x8xf32>
    %78 = vector.shape_cast %77 : vector<8x8xf32> to vector<8x8x1xf32>
    %79 = vector.broadcast %78 : vector<8x8x1xf32> to vector<8x8x32xf32>
    %80 = arith.mulf %62, %79 : vector<8x8x32xf32>
    %cst_39 = arith.constant dense<0.000000e+00> : vector<8x32xf32>
    %81 = vector.multi_reduction <add>, %80, %cst_39 [1] : vector<8x8x32xf32> to vector<8x32xf32>
    %82 = arith.truncf %81 : vector<8x32xf32> to vector<8x32xbf16>
    %cst_40 = arith.constant dense<0.000000e+00> : vector<8x32xf32>
    %83 = tpu.matmul %82, %4, %cst_40 {dimension_numbers = #tpu.dot_dimension_numbers<[1], [0], [0], [1], [0, 0, 1, 1], [], []>} : vector<8x32xbf16>, vector<32x32xbf16>, vector<8x32xf32> -> vector<8x32xf32>
    %84 = vector.broadcast %10 : vector<1x32xf32> to vector<8x32xf32>
    %85 = arith.addf %83, %84 : vector<8x32xf32>
    %86 = vector.shape_cast %55 : vector<64x32xf32> to vector<8x8x32xf32>
    %cst_41 = arith.constant dense<0.000000e+00> : vector<8x32xf32>
    %87 = vector.multi_reduction <add>, %86, %cst_41 [1] : vector<8x8x32xf32> to vector<8x32xf32>
    %88 = vector.broadcast %7 : vector<8x1xf32> to vector<8x32xf32>
    %89 = arith.mulf %87, %88 : vector<8x32xf32>
    %90 = tpu.concatenate %85, %54, %89 in 1 : vector<8x32xf32>, vector<8x32xf32>, vector<8x32xf32> -> vector<8x96xf32>
    %91 = arith.truncf %90 : vector<8x96xf32> to vector<8x96xbf16>
    %c0_42 = arith.constant 0 : index
    %c0_43 = arith.constant 0 : index
    %92 = vector.load %arg1[%c0_42, %c0_43] : memref<96x64xbf16, #tpu.memory_space<vmem>>, vector<96x64xbf16>
    %cst_44 = arith.constant dense<0.000000e+00> : vector<8x64xf32>
    %93 = tpu.matmul %91, %92, %cst_44 {dimension_numbers = #tpu.dot_dimension_numbers<[1], [0], [0], [1], [0, 0, 1, 1], [], []>} : vector<8x96xbf16>, vector<96x64xbf16>, vector<8x64xf32> -> vector<8x64xf32>
    %94 = vector.broadcast %13 : vector<1x64xf32> to vector<8x64xf32>
    %95 = arith.addf %93, %94 : vector<8x64xf32>
    %cst_45 = arith.constant 0.000000e+00 : f32
    %96 = vector.broadcast %cst_45 : f32 to vector<8x64xf32>
    %97 = arith.cmpf oge, %95, %96 : vector<8x64xf32>
    %cst_46 = arith.constant 0.00999999977 : f32
    %98 = vector.broadcast %cst_46 : f32 to vector<8x64xf32>
    %99 = arith.mulf %98, %95 : vector<8x64xf32>
    %100 = arith.select %97, %95, %99 : vector<8x64xi1>, vector<8x64xf32>
    %101 = vector.extract_strided_slice %100 {offsets = [0, 0], sizes = [8, 32], strides = [1, 1]} : vector<8x64xf32> to vector<8x32xf32>
    %102 = vector.extract_strided_slice %100 {offsets = [0, 32], sizes = [8, 32], strides = [1, 1]} : vector<8x64xf32> to vector<8x32xf32>
    %103 = vector.broadcast %14 : vector<1x32xf32> to vector<8x32xf32>
    %104 = arith.mulf %101, %103 : vector<8x32xf32>
    %cst_47 = arith.constant dense<0.000000e+00> : vector<8xf32>
    %105 = vector.multi_reduction <add>, %104, %cst_47 [1] : vector<8x32xf32> to vector<8xf32>
    %106 = vector.shape_cast %105 : vector<8xf32> to vector<8x1xf32>
    %107 = vector.broadcast %15 : vector<1x1xf32> to vector<8x1xf32>
    %108 = arith.addf %106, %107 : vector<8x1xf32>
    %109 = arith.truncf %102 : vector<8x32xf32> to vector<8x32xbf16>
    %cst_48 = arith.constant dense<0.000000e+00> : vector<8x32xf32>
    %110 = tpu.matmul %109, %5, %cst_48 {dimension_numbers = #tpu.dot_dimension_numbers<[1], [0], [0], [1], [0, 0, 1, 1], [], []>} : vector<8x32xbf16>, vector<32x32xbf16>, vector<8x32xf32> -> vector<8x32xf32>
    %111 = vector.broadcast %11 : vector<1x32xf32> to vector<8x32xf32>
    %112 = arith.addf %110, %111 : vector<8x32xf32>
    %cst_49 = arith.constant 0.000000e+00 : f32
    %113 = vector.broadcast %cst_49 : f32 to vector<8x128xf32>
    %c0_50 = arith.constant 0 : index
    %c0_51 = arith.constant 0 : index
    %114 = vector.load %arg4[%c0_50, %c0_51] : memref<8x128xf32, #tpu.memory_space<vmem>>, vector<8x128xf32>
    tpu.vector_store %arg4[%c0_50, %c0_51], %113 {strides = array<i32>} : memref<8x128xf32, #tpu.memory_space<vmem>>, vector<8x128xf32>,
    %c0_52 = arith.constant 0 : index
    %c0_53 = arith.constant 0 : index
    %115 = vector.load %arg4[%c0_52, %c0_53] : memref<8x128xf32, #tpu.memory_space<vmem>>, vector<8x32xf32>
    tpu.vector_store %arg4[%c0_52, %c0_53], %112 {strides = array<i32>} : memref<8x128xf32, #tpu.memory_space<vmem>>, vector<8x32xf32>,
    %116 = vector.shape_cast %108 : vector<8x1xf32> to vector<8x1xf32>
    %117 = vector.broadcast %116 : vector<8x1xf32> to vector<8x32xf32>
    %c0_54 = arith.constant 0 : index
    %c32_55 = arith.constant 32 : index
    %118 = vector.load %arg4[%c0_54, %c32_55] : memref<8x128xf32, #tpu.memory_space<vmem>>, vector<8x32xf32>
    tpu.vector_store %arg4[%c0_54, %c32_55], %117 {strides = array<i32>} : memref<8x128xf32, #tpu.memory_space<vmem>>, vector<8x32xf32>,
    return
  }
}

</mosaic_0001>

<bundles_post_ra>
// kernel: geograph_forward.1
= control target key start
LH: loop header
LB: loop body
LE: loop exit
PB: predicated region body
PF: predicated region fallthrough
CT: control target
= control target key end

     0   :  { %s1781_s19 = smov 32   ;;  %s1782_s20 = smov 64   ;;  %vm54_vm0 = vcmask 261120   ;;  %vm1785_vm9 = vmmov 0   ;;  %vm846_vm10 = vcmask 1041409   ;;  %vm848_vm11 = vcmask 1042434   ;;  %s2274_s0 = inlined_call_operand.vmem [shape: bf16[32,256], index: 0, kind: input, shape index: {}]   ;;  %s2275_s3 = inlined_call_operand.vmem [shape: f32[16,128], index: 3, kind: input, shape index: {}]   ;;  %s2276_s2 = inlined_call_operand.vmem [shape: bf16[80,32], index: 2, kind: input, shape index: {}]   ;;  %s2277_s1 = inlined_call_operand.vmem [shape: bf16[96,64], index: 1, kind: input, shape index: {}]   ;;  %s2278_s4 = inlined_call_operand.vmem [shape: f32[8,128], index: 4, kind: output, shape index: {}]  }
   0x1   :  { %v1818_v0 = vld [vmem:[%s2274_s0 + $0x10] ss:$8 sps:$4 sm:$0xff]   ;;  %v1823_v1 = vld [vmem:[%s2274_s0] ss:$8 sps:$4 sm:$0xff]   ;;  %v1853_v49 = vld [vmem:[%s2274_s0 + $0x14] ss:$8 sps:$4 sm:$0xff]  }
   0x2   :  { %50 = vrot.lane.b32.xlu0 %v1818_v0, %s1781_s19  ;;  %44 = vrot.lane.b32.xlu1 %v1823_v1, %s1782_s20  ;;  %v1839_v6 = vld [vmem:[%s2275_s3 + $0x8] ss:$0 sm:$0xff]  ;;  %v1860_v50 = vld [vmem:[%s2274_s0 + $0x4] ss:$8 sps:$4 sm:$0xff]   ;;  %s1783_s27 = smov 96   ;;  %vm850_vm12 = vcmask 1043459  }
   0x3   :  { %vm852_vm13 = vcmask 1044484   ;;  %vm854_vm14 = vcmask 1045509   ;;  %vm856_vm15 = vcmask 1046534  }
   0x6   :  { %48 = vrot.lane.b32.xlu0 %v1823_v1, %s1781_s19  ;;  %46 = vrot.lane.b32.xlu1 %v1818_v0, %s1782_s20 }
  0x74   :  { %v51_v2 = vpop.permute.xlu0 %50  ;;  %v45_v3 = vpop.permute.xlu1 %44 }
  0x75   :  { %1613 = vmatprep.subr.bf16.mxu0 %v51_v2  ;;  %1617 = vmatprep.mubr.msk.bf16.mxu0 %vm54_vm0, %v45_v3 }
  0x76   :  { %1614 = vmatpush3.bf16.msra.mxu0 %v51_v2  ;;  %1625 = vmatprep.mubr.msk.bf16.mxu1 %vm54_vm0, %v45_v3 }
  0x78   :  { %v49_v4 = vpop.permute.xlu0 %48  ;;  %v47_v5 = vpop.permute.xlu1 %46 }
  0x79   :  { %1615 = vmatprep.subr.bf16.mxu0 %v49_v4 }
  0x7a   :  { %1616 = vmatpush3.bf16.msra.mxu0 %v49_v4 }
  0x7b   :  { %1629 = vmatprep.subr.bf16.mxu0 %v1853_v49 }
  0x7d   :  { %1618 = vmatmul.mubr.msk.bf16.vlgmr.msra.gmra.mxu0 %vm54_vm0, %v47_v5 }
  0x7e   :  { %1630 = vmatpush3.bf16.msra.mxu0 %v1853_v49 }
  0x7f   :  { %1631 = vmatprep.subr.bf16.mxu0 %v1860_v50 }
  0x82   :  { %1632 = vmatpush3.bf16.msra.mxu0 %v1860_v50 }
 0x13d   :  { %v1619_v7 = vpop.f32.mrf.mxu0 }
 0x13e   :  { %v104_v8 = vadd.f32 %v1619_v7, %v1839_v6 }
 0x13f   :  { %v95_v9 = vpop.f32.mrf.mxu0 }
 0x140   :  { %vm112_vm1 = vcmp.ge.f32.partialorder %v104_v8, 0.0  ;;  %v116_v10 = vmul.f32 0.01, %v104_v8  ;;  %v96_v11 = vadd.f32 %v1839_v6, %v95_v9 }
 0x141   :  { %v1620_v12 = vpop.f32.mrf.mxu0 }
 0x142   :  { %vm110_vm2 = vcmp.ge.f32.partialorder %v96_v11, 0.0  ;;  %v114_v13 = vmul.f32 0.01, %v96_v11  ;;  %v107_v14 = vadd.f32 %v1620_v12, %v1839_v6  ;;  %v120_v15 = vsel %vm112_vm1, %v104_v8, %v116_v10 }
 0x143   :  { %v98_v16 = vpop.f32.mrf.mxu0  ;;  %v124_v17 = vmul.f32 %v120_v15, %v120_v15  ;;  %vm858_vm1 = vcmask 1047559  }
 0x144   :  { %vm113_vm3 = vcmp.ge.f32.partialorder %v107_v14, 0.0  ;;  %v117_v18 = vmul.f32 0.01, %v107_v14  ;;  %v99_v19 = vadd.f32 %v1839_v6, %v98_v16  ;;  %v118_v20 = vsel %vm110_vm2, %v96_v11, %v114_v13 }
 0x145   :  { %v132_v21 = vsel %vm54_vm0, %v124_v17, 0.0  ;;  %v122_v22 = vmul.f32 %v118_v20, %v118_v20  ;;  %vm861_vm2 = vcmask 64512  }
 0x146   :  { %vm111_vm4 = vcmp.ge.f32.partialorder %v99_v19, 0.0  ;;  %v115_v23 = vmul.f32 0.01, %v99_v19  ;;  %133 = vadd.xlane.f32.xlu0 %v132_v21  ;;  %v121_v24 = vsel %vm113_vm3, %v107_v14, %v117_v18  ;;  %vm1103_vm3 = vcmask 523520  }
 0x147   :  { %v125_v25 = vmul.f32 %v121_v24, %v121_v24  ;;  %v126_v28 = vsel %vm54_vm0, %v122_v22, 0.0 }
 0x148   :  { %v119_v26 = vsel %vm111_vm4, %v99_v19, %v115_v23  ;;  %vm1358_vm4 = vcmask 523264  }
 0x149   :  { %v135_v27 = vsel %vm54_vm0, %v125_v25, 0.0  ;;  %v123_v29 = vmul.f32 %v119_v26, %v119_v26 }
 0x14a   :  { %136 = vadd.xlane.f32.xlu1 %v135_v27  ;;  %127 = vadd.xlane.f32.xlu0 %v126_v28 }
 0x14b   :  { %v129_v30 = vsel %vm54_vm0, %v123_v29, 0.0 }
 0x14e   :  { %130 = vadd.xlane.f32.xlu0 %v129_v30 }
 0x15b   :  { %216 = vrot.lane.b32.xlu1 %v1839_v6, %s1783_s27 }
 0x1cf   :  { %v134_v31 = vpop.xlane.xlu0 %133 }
 0x1d0   :  { %v140_v32 = vmax.f32 %v134_v31, 1e-24 }
 0x1d2   :  { %1745 = vrsqrt.f32 %v140_v32 }
 0x1d3   :  { %v137_v33 = vpop.xlane.xlu1 %136  ;;  %v128_v34 = vpop.xlane.xlu0 %127 }
 0x1d4   :  { %v141_v35 = vmax.f32 %v137_v33, 1e-24  ;;  %v138_v36 = vmax.f32 %v128_v34, 1e-24 }
 0x1d6   :  { %1747 = vrsqrt.f32 %v141_v35 }
 0x1d7   :  { %v131_v37 = vpop.xlane.xlu0 %130  ;;  %1749 = vrsqrt.f32 %v138_v36  ;;  %v217_v57 = vpop.permute.xlu1 %216 }
 0x1d8   :  { %v139_v38 = vmax.f32 %v131_v37, 1e-24  ;;  %v1734_v37 = vld [vmem:[%s2276_s2] sm:$0xff]  }
 0x1da   :  { %1751 = vrsqrt.f32 %v139_v38  ;;  %v1735_v38 = vld [vmem:[%s2276_s2 + $0x8] sm:$0xff]  }
 0x1df   :  { %v1746_v39 = vpop.eup %1745 }
 0x1e0   :  { %v148_v41 = vmul.f32 %v1746_v39, %v120_v15  ;;  %v1736_v39 = vld [vmem:[%s2276_s2 + $0x10] sm:$0xff]  }
 0x1e3   :  { %v1748_v40 = vpop.eup %1747 }
 0x1e4   :  { %v149_v42 = vmul.f32 %v1748_v40, %v121_v24  ;;  %v1750_v43 = vpop.eup %1749  ;;  %v1737_v40 = vld [vmem:[%s2276_s2 + $0x18] sm:$0xff]  }
 0x1e5   :  { %v146_v46 = vmul.f32 %v1750_v43, %v118_v20  ;;  %v1784_v20 = vmov 0.0  }
 0x1e6   :  { %v151_v44 = vpack.c.bf16 %v149_v42, %v148_v41  ;;  %1661 = vmatprep.subr.bf16.mxu0 %v1784_v20  ;;  %v1738_v41 = vld [vmem:[%s2276_s2 + $0x20] sm:$0xff]   ;;  %1525 = vst [vmem:[%s2278_s4] sm:$0xff] %v1784_v20 }
 0x1e7   :  { %v1752_v45 = vpop.eup %1751 }
 0x1e8   :  { %1621 = vmatprep.subr.bf16.mxu1 %v151_v44  ;;  %v147_v47 = vmul.f32 %v1752_v45, %v119_v26 }
 0x1e9   :  { %1622 = vmatpush3.bf16.msra.mxu1 %v151_v44 }
 0x1ea   :  { %v150_v48 = vpack.c.bf16 %v147_v47, %v146_v46 }
 0x1ec   :  { %1623 = vmatprep.subr.bf16.mxu1 %v150_v48 }
 0x1ed   :  { %1624 = vmatpush3.bf16.msra.mxu1 %v150_v48 }
 0x1ee   :  { %1637 = vmatprep.subr.bf16.mxu1 %v1784_v20 }
 0x1f0   :  { %1626 = vmatmul.mubr.msk.bf16.vlgmr.msra.gmra.mxu1 %vm54_vm0, %v47_v5 }
 0x1f1   :  { %1641 = vmatprep.mubr.msk.bf16.mxu1 %vm1785_vm9, %v1784_v20 }
 0x2b0   :  { %v1627_v51 = vpop.f32.mrf.mxu1 }
 0x2b2   :  { %v186_v52 = vpop.f32.mrf.mxu1 }
 0x2b4   :  { %v1628_v53 = vpop.f32.mrf.mxu1 }
 0x2b5   :  { %v202_v56 = vpack.c.bf16 %v1628_v53, %v1627_v51 }
 0x2b6   :  { %v189_v54 = vpop.f32.mrf.mxu1 }
 0x2b7   :  { %v201_v55 = vpack.c.bf16 %v189_v54, %v186_v52 }
 0x2b9   :  { %1633 = vmatprep.mubr.msk.bf16.mxu0 %vm54_vm0, %v201_v55 }
 0x2ba   :  { %1634 = vmatmul.mubr.msk.bf16.vlgmr.msra.gmra.mxu0 %vm54_vm0, %v202_v56 }
 0x2bb   :  { %1662 = vmatpush3.bf16.msra.mxu0 %v1818_v0  ;;  %1665 = vmatprep.mubr.msk.bf16.mxu0 %vm1785_vm9, %v1784_v20 }
 0x2bc   :  { %1663 = vmatprep.subr.bf16.mxu0 %v1784_v20 }
 0x2bf   :  { %1664 = vmatpush3.bf16.msra.mxu0 %v1823_v1 }
 0x2c0   :  { %1693 = vmatprep.subr.bf16.mxu0 %v1784_v20 }
 0x37a   :  { %v1635_v58 = vpop.f32.mrf.mxu0 }
 0x37b   :  { %v268_v59 = vadd.f32 %v1635_v58, %v217_v57 }
 0x37c   :  { %v259_v60 = vpop.f32.mrf.mxu0 }
 0x37d   :  { %vm276_vm5 = vcmp.ge.f32.partialorder %v268_v59, 0.0  ;;  %v280_v61 = vmul.f32 0.01, %v268_v59  ;;  %v260_v62 = vadd.f32 %v259_v60, %v217_v57 }
 0x37e   :  { %v1636_v63 = vpop.f32.mrf.mxu0 }
 0x37f   :  { %vm274_vm6 = vcmp.ge.f32.partialorder %v260_v62, 0.0  ;;  %v278_v2 = vmul.f32 0.01, %v260_v62  ;;  %v271_v3 = vadd.f32 %v1636_v63, %v217_v57  ;;  %v284_v4 = vsel %vm276_vm5, %v268_v59, %v280_v61 }
 0x380   :  { %v262_v5 = vpop.f32.mrf.mxu0  ;;  %v288_v6 = vmul.f32 %v284_v4, %v284_v4  ;;  %vm1413_vm5 = vcmask 785408  }
 0x381   :  { %vm277_vm7 = vcmp.ge.f32.partialorder %v271_v3, 0.0  ;;  %v281_v7 = vmul.f32 0.01, %v271_v3  ;;  %v263_v8 = vadd.f32 %v262_v5, %v217_v57  ;;  %v282_v9 = vsel %vm274_vm6, %v260_v62, %v278_v2 }
 0x382   :  { %v296_v10 = vsel %vm54_vm0, %v288_v6, 0.0  ;;  %v286_v11 = vmul.f32 %v282_v9, %v282_v9 }
 0x383   :  { %v279_v12 = vmul.f32 0.01, %v263_v8  ;;  %297 = vadd.xlane.f32.xlu0 %v296_v10  ;;  %v285_v13 = vsel %vm277_vm7, %v271_v3, %v281_v7  ;;  %vm275_vm8 = vcmp.ge.f32.partialorder %v263_v8, 0.0  ;;  %v1786_v7 = vmov 1966171168  }
 0x384   :  { %v290_v14 = vsel %vm54_vm0, %v286_v11, 0.0  ;;  %v289_v15 = vmul.f32 %v285_v13, %v285_v13 }
 0x385   :  { %v283_v16 = vsel %vm275_vm8, %v263_v8, %v279_v12  ;;  %v540_v8 = vunpack.c.l.s4 %v1786_v7  ;;  %v1962_v12 = vld [vmem:[%s2275_s3 + $0x9] ss:$0 sm:$0xff] }
 0x386   :  { %v299_v17 = vsel %vm54_vm0, %v289_v15, 0.0  ;;  %v287_v18 = vmul.f32 %v283_v16, %v283_v16 }
 0x387   :  { %291 = vadd.xlane.f32.xlu0 %v290_v14  ;;  %v541_v10 = vunpack.c.0.s8 %v540_v8 }
 0x388   :  { %v293_v19 = vsel %vm54_vm0, %v287_v18, 0.0 }
 0x38b   :  { %300 = vadd.xlane.f32.xlu0 %v299_v17 }
 0x38f   :  { %294 = vadd.xlane.f32.xlu0 %v293_v19 }
 0x40c   :  { %v298_v21 = vpop.xlane.xlu0 %297 }
 0x40d   :  { %v304_v23 = vmax.f32 %v298_v21, 1e-24 }
 0x40f   :  { %1753 = vrsqrt.f32 %v304_v23 }
 0x410   :  { %v292_v22 = vpop.xlane.xlu0 %291 }
 0x411   :  { %v302_v25 = vmax.f32 %v292_v22, 1e-24 }
 0x414   :  { %v301_v24 = vpop.xlane.xlu0 %300 }
 0x415   :  { %v305_v0 = vmax.f32 %v301_v24, 1e-24 }
 0x417   :  { %1755 = vrsqrt.f32 %v305_v0 }
 0x418   :  { %v295_v26 = vpop.xlane.xlu0 %294  ;;  %1757 = vrsqrt.f32 %v302_v25 }
 0x419   :  { %v303_v1 = vmax.f32 %v295_v26, 1e-24 }
 0x41b   :  { %1759 = vrsqrt.f32 %v303_v1 }
 0x41c   :  { %v1754_v27 = vpop.eup %1753 }
 0x41d   :  { %v312_v29 = vmul.f32 %v1754_v27, %v284_v4 }
 0x424   :  { %v1756_v28 = vpop.eup %1755 }
 0x425   :  { %v313_v30 = vmul.f32 %v1756_v28, %v285_v13  ;;  %v1758_v31 = vpop.eup %1757 }
 0x426   :  { %v310_v34 = vmul.f32 %v1758_v31, %v282_v9  ;;  %v542_v9 = vlaneseq }
 0x427   :  { %v325_v32 = vpack.c.bf16 %v313_v30, %v312_v29 }
 0x428   :  { %v1760_v33 = vpop.eup %1759  ;;  %v1957_v11 = vshrl.u32 %v542_v9, 7 }
 0x429   :  { %1638 = vmatpush3.bf16.msra.mxu1 %v325_v32  ;;  %v311_v35 = vmul.f32 %v1760_v33, %v283_v16 }
 0x42a   :  { %1639 = vmatprep.subr.bf16.mxu1 %v1784_v20  ;;  %v544_v13 = vsub.s32 %v541_v10, %v1957_v11  ;;  %v1967_v19 = vsub.s32 0, %v1957_v11 }
 0x42b   :  { %v324_v36 = vpack.c.bf16 %v311_v35, %v310_v34 }
 0x42d   :  { %1640 = vmatpush3.bf16.msra.mxu1 %v324_v36 }
 0x42e   :  { %1685 = vmatprep.subr.bf16.mxu1 %v1784_v20 }
 0x430   :  { %1642 = vmatmul.mubr.msk.bf16.vlgmr.msra.gmra.mxu1 %vm54_vm0, %v1734_v37  ;;  %v1979_v37 = vld [vmem:[%s2275_s3] sm:$0xff] }
 0x431   :  { %1645 = vmatprep.mubr.msk.bf16.mxu1 %vm1785_vm9, %v1784_v20 }
 0x438   :  { %1646 = vmatmul.mubr.msk.bf16.gmra.mxu1 %vm54_vm0, %v1735_v38 }
 0x439   :  { %1649 = vmatprep.mubr.msk.bf16.mxu1 %vm1785_vm9, %v1784_v20 }
 0x440   :  { %1650 = vmatmul.mubr.msk.bf16.gmra.mxu1 %vm54_vm0, %v1736_v39 }
 0x441   :  { %1653 = vmatprep.mubr.msk.bf16.mxu1 %vm1785_vm9, %v1784_v20 }
 0x448   :  { %1654 = vmatmul.mubr.msk.bf16.gmra.mxu1 %vm54_vm0, %v1737_v40 }
 0x449   :  { %1657 = vmatprep.mubr.msk.bf16.mxu1 %vm1785_vm9, %v1784_v20 }
 0x450   :  { %1658 = vmatmul.mubr.msk.bf16.gmra.mxu1 %vm54_vm0, %v1738_v41  ;;  %v711_v41 = vrot.slane %v1979_v37, %v1967_v19 }
 0x451   :  { %1689 = vmatprep.mubr.msk.bf16.mxu1 %vm1785_vm9, %v1784_v20 }
 0x4f0   :  { %v1914_v42 = vpop.f32.mrf.mxu1 }
 0x4f2   :  { %v1643_v43 = vpop.f32.mrf.mxu1 }
 0x4f4   :  { %v1916_v44 = vpop.f32.mrf.mxu1 }
 0x4f5   :  { %v439_v45 = vpack.c.bf16 %v1916_v44, %v1914_v42 }
 0x4f6   :  { %v1644_v46 = vpop.f32.mrf.mxu1 }
 0x4f7   :  { %1666 = vmatmul.mubr.msk.bf16.vlgmr.msra.gmra.mxu0 %vm54_vm0, %v439_v45 }
 0x4f8   :  { %v1921_v47 = vpop.f32.mrf.mxu1  ;;  %1669 = vmatprep.mubr.msk.bf16.mxu0 %vm1785_vm9, %v1784_v20 }
 0x4fa   :  { %v1647_v48 = vpop.f32.mrf.mxu1 }
 0x4fc   :  { %v1925_v51 = vpop.f32.mrf.mxu1 }
 0x4fd   :  { %v440_v52 = vpack.c.bf16 %v1925_v51, %v1921_v47 }
 0x4fe   :  { %v1648_v53 = vpop.f32.mrf.mxu1 }
 0x4ff   :  { %1670 = vmatmul.mubr.msk.bf16.gmra.mxu0 %vm54_vm0, %v440_v52 }
 0x500   :  { %v1930_v54 = vpop.f32.mrf.mxu1  ;;  %1673 = vmatprep.mubr.msk.bf16.mxu0 %vm1785_vm9, %v1784_v20 }
 0x502   :  { %v1651_v55 = vpop.f32.mrf.mxu1 }
 0x504   :  { %v1934_v56 = vpop.f32.mrf.mxu1 }
 0x505   :  { %v441_v57 = vpack.c.bf16 %v1934_v56, %v1930_v54 }
 0x506   :  { %v1652_v58 = vpop.f32.mrf.mxu1 }
 0x507   :  { %1674 = vmatmul.mubr.msk.bf16.gmra.mxu0 %vm54_vm0, %v441_v57  ;;  %v1991_v58 = vsub.s32 1, %v1957_v11 }
 0x508   :  { %v1939_v59 = vpop.f32.mrf.mxu1  ;;  %1677 = vmatprep.mubr.msk.bf16.mxu0 %vm1785_vm9, %v1784_v20 }
 0x50a   :  { %v1655_v60 = vpop.f32.mrf.mxu1 }
 0x50c   :  { %v1943_v61 = vpop.f32.mrf.mxu1 }
 0x50d   :  { %v442_v62 = vpack.c.bf16 %v1943_v61, %v1939_v59 }
 0x50e   :  { %v1656_v63 = vpop.f32.mrf.mxu1 }
 0x50f   :  { %1678 = vmatmul.mubr.msk.bf16.gmra.mxu0 %vm54_vm0, %v442_v62 }
 0x510   :  { %v1948_v2 = vpop.f32.mrf.mxu1  ;;  %1681 = vmatprep.mubr.msk.bf16.mxu0 %vm1785_vm9, %v1784_v20 }
 0x512   :  { %v1659_v3 = vpop.f32.mrf.mxu1 }
 0x513   :  { %v718_v3 = vrot.slane %v1979_v37, %v1991_v58 }
 0x514   :  { %v435_v4 = vpop.f32.mrf.mxu1 }
 0x515   :  { %v443_v5 = vpack.c.bf16 %v435_v4, %v1948_v2 }
 0x516   :  { %v1660_v6 = vpop.f32.mrf.mxu1 }
 0x517   :  { %1682 = vmatmul.mubr.msk.bf16.gmra.mxu0 %vm54_vm0, %v443_v5 }
 0x518   :  { %1705 = vmatprep.mubr.msk.bf16.mxu0 %vm1785_vm9, %v1784_v20 }
 0x5b7   :  { %v499_v14 = vpop.f32.mrf.mxu0 }
 0x5b8   :  { %v500_v15 = vadd.f32 %v1962_v12, %v499_v14 }
 0x5b9   :  { %v1667_v16 = vpop.f32.mrf.mxu0 }
 0x5ba   :  { %v538_v17 = vcombine.high %v500_v15, %v500_v15  ;;  %v545_v18 = vrot.slane %v500_v15, %v544_v13 }
 0x5bb   :  { %v502_v21 = vpop.f32.mrf.mxu0 }
 0x5bc   :  { %v552_v22 = vrot.slane %v538_v17, %v544_v13  ;;  %v553_v23 = vcombine.high %v545_v18, %v545_v18  ;;  %v561_v24 = vrot.slane %v545_v18, %v544_v13  ;;  %v1998_v10 = vadd.f32 %v1962_v12, %v502_v21 }
 0x5bd   :  { %v1668_v25 = vpop.f32.mrf.mxu0 }
 0x5be   :  { %v554_v0 = vcombine.high %v552_v22, %v552_v22  ;;  %v590_v26 = vrot.slane %v561_v24, %v1967_v19  ;;  %v575_v1 = vrot.slane %v553_v23, %v544_v13  ;;  %v583_v27 = vcombine.high %v561_v24, %v561_v24 }
 0x5bf   :  { %v507_v28 = vpop.f32.mrf.mxu0  ;;  %v568_v34 = vrot.slane %v552_v22, %v544_v13 }
 0x5c0   :  { %619 = vrot.lane.b32.xlu1 %v590_v26, %s1781_s19  ;;  %v594_v29 = vrot.slane %v575_v1, %v1967_v19  ;;  %v582_v30 = vrot.slane %v554_v0, %v544_v13  ;;  %v598_v32 = vrot.slane %v583_v27, %v1967_v19  ;;  %v585_v40 = vcombine.high %v575_v1, %v575_v1 }
 0x5c1   :  { %v1671_v31 = vpop.f32.mrf.mxu0  ;;  %v606_v39 = vrot.slane %v568_v34, %v1967_v19  ;;  %v584_v55 = vcombine.high %v568_v34, %v568_v34  ;;  %v2001_v14 = vadd.f32 %v1962_v12, %v507_v28  ;;  %v2037_v34 = vsub.s32 3, %v1957_v11 }
 0x5c2   :  { %621 = vrot.lane.b32.xlu0 %v594_v29, %s1781_s19  ;;  %v586_v33 = vcombine.high %v582_v30, %v582_v30  ;;  %v602_v46 = vrot.slane %v585_v40, %v1967_v19  ;;  %v610_v53 = vrot.slane %v582_v30, %v1967_v19  ;;  %v2046_v40 = vsub.s32 4, %v1957_v11 }
 0x5c3   :  { %v510_v35 = vpop.f32.mrf.mxu0  ;;  %v614_v62 = vrot.slane %v584_v55, %v1967_v19 }
 0x5c4   :  { %623 = vrot.lane.b32.xlu1 %v598_v32, %s1781_s19  ;;  %v618_v36 = vrot.slane %v586_v33, %v1967_v19  ;;  %v2005_v17 = vadd.f32 %v1962_v12, %v510_v35  ;;  %v2034_v33 = vsub.s32 2, %v1957_v11 }
 0x5c5   :  { %v1672_v38 = vpop.f32.mrf.mxu0 }
 0x5c6   :  { %633 = vrot.lane.b32.xlu0 %v618_v36, %s1781_s19 }
 0x5c7   :  { %v515_v43 = vpop.f32.mrf.mxu0 }
 0x5c8   :  { %627 = vrot.lane.b32.xlu1 %v606_v39, %s1781_s19  ;;  %v2017_v0 = vadd.f32 %v1962_v12, %v515_v43  ;;  %v725_v39 = vrot.slane %v1979_v37, %v2034_v33  ;;  %v2051_v43 = vsub.s32 5, %v1957_v11 }
 0x5c9   :  { %v1675_v45 = vpop.f32.mrf.mxu0 }
 0x5ca   :  { %713 = vbcast.lane.b32.xlu0 %v711_v41, 256  ;;  %v732_v41 = vrot.slane %v1979_v37, %v2037_v34  ;;  %v739_v45 = vrot.slane %v1979_v37, %v2046_v40 }
 0x5cb   :  { %v518_v48 = vpop.f32.mrf.mxu0 }
 0x5cc   :  { %625 = vrot.lane.b32.xlu1 %v602_v46, %s1781_s19  ;;  %v2012_v21 = vadd.f32 %v1962_v12, %v518_v48  ;;  %v746_v46 = vrot.slane %v1979_v37, %v2051_v43 }
 0x5cd   :  { %v1676_v52 = vpop.f32.mrf.mxu0 }
 0x5cf   :  { %v523_v57 = vpop.f32.mrf.mxu0 }
 0x5d0   :  { %629 = vrot.lane.b32.xlu1 %v610_v53, %s1781_s19  ;;  %v2022_v27 = vadd.f32 %v1962_v12, %v523_v57 }
 0x5d1   :  { %v1679_v60 = vpop.f32.mrf.mxu0 }
 0x5d3   :  { %v526_v63 = vpop.f32.mrf.mxu0 }
 0x5d4   :  { %631 = vrot.lane.b32.xlu1 %v614_v62, %s1781_s19  ;;  %v2030_v32 = vadd.f32 %v1962_v12, %v526_v63 }
 0x5d5   :  { %v1680_v4 = vpop.f32.mrf.mxu0 }
 0x5d7   :  { %v531_v5 = vpop.f32.mrf.mxu0 }
 0x5d8   :  { %720 = vbcast.lane.b32.xlu1 %v718_v3, 256  ;;  %v2026_v29 = vadd.f32 %v1962_v12, %v531_v5 }
 0x5d9   :  { %v1683_v6 = vpop.f32.mrf.mxu0 }
 0x5db   :  { %v534_v7 = vpop.f32.mrf.mxu0 }
 0x5dc   :  { %v1787_v7 = vmov 0  }
 0x5dd   :  { %v1684_v8 = vpop.f32.mrf.mxu0  ;;  %1726 = vset.pattern.permute.xlu1 %v1787_v7  ;;  %1727 = vset.pattern.permute.xlu0 %v1787_v7 }
 0x632   :  { %v620_v13 = vpop.permute.xlu1 %619 }
 0x633   :  { %v643_v15 = vmul.f32 %v620_v13, %v1998_v10 }
 0x634   :  { %v622_v16 = vpop.permute.xlu0 %621 }
 0x635   :  { %v644_v18 = vmul.f32 %v622_v16, %v2001_v14  ;;  %659 = vrot.lane.b32.xlu1 %v643_v15, %s1783_s27 }
 0x636   :  { %v624_v22 = vpop.permute.xlu1 %623 }
 0x637   :  { %v645_v23 = vmul.f32 %v624_v22, %v2005_v17  ;;  %661 = vrot.lane.b32.xlu0 %v644_v18, %s1783_s27 }
 0x638   :  { %v634_v31 = vpop.permute.xlu0 %633 }
 0x639   :  { %663 = vrot.lane.b32.xlu1 %v645_v23, %s1783_s27  ;;  %v650_v36 = vmul.f32 %v634_v31, %v2026_v29  ;;  %v2066_v23 = vsub.s32 6, %v1957_v11 }
 0x63a   :  { %v628_v24 = vpop.permute.xlu1 %627 }
 0x63b   :  { %v647_v25 = vmul.f32 %v628_v24, %v2012_v21  ;;  %v753_v24 = vrot.slane %v1979_v37, %v2066_v23 }
 0x63c   :  { %v714_v52 = vpop.permute.xlu0 %713 }
 0x63d   :  { %667 = vrot.lane.b32.xlu1 %v647_v25, %s1783_s27  ;;  %v2071_v25 = vsub.s32 7, %v1957_v11 }
 0x63e   :  { %v626_v26 = vpop.permute.xlu1 %625 }
 0x63f   :  { %v646_v1 = vmul.f32 %v626_v26, %v2017_v0  ;;  %v760_v26 = vrot.slane %v1979_v37, %v2071_v25 }
 0x641   :  { %665 = vrot.lane.b32.xlu0 %v646_v1, %s1783_s27 }
 0x642   :  { %v630_v28 = vpop.permute.xlu1 %629 }
 0x643   :  { %v648_v30 = vmul.f32 %v630_v28, %v2022_v27 }
 0x645   :  { %669 = vrot.lane.b32.xlu0 %v648_v30, %s1783_s27 }
 0x646   :  { %v632_v35 = vpop.permute.xlu1 %631 }
 0x647   :  { %v649_v38 = vmul.f32 %v632_v35, %v2030_v32 }
 0x649   :  { %671 = vrot.lane.b32.xlu1 %v649_v38, %s1783_s27  ;;  %673 = vrot.lane.b32.xlu0 %v650_v36, %s1783_s27 }
 0x64a   :  { %v721_v48 = vpop.permute.xlu1 %720 }
 0x64d   :  { %727 = vbcast.lane.b32.xlu1 %v725_v39, 256  ;;  %734 = vbcast.lane.b32.xlu0 %v732_v41, 256 }
 0x651   :  { %741 = vbcast.lane.b32.xlu1 %v739_v45, 256  ;;  %748 = vbcast.lane.b32.xlu0 %v746_v46, 256 }
 0x6a7   :  { %v660_v53 = vpop.permute.xlu1 %659 }
 0x6a8   :  { %v683_v55 = vsel %vm54_vm0, %v660_v53, 0.0 }
 0x6a9   :  { %v662_v57 = vpop.permute.xlu0 %661  ;;  %684 = vadd.xlane.f32.xlu1 %v683_v55 }
 0x6aa   :  { %v686_v60 = vsel %vm54_vm0, %v662_v57, 0.0 }
 0x6ab   :  { %v664_v62 = vpop.permute.xlu1 %663  ;;  %687 = vadd.xlane.f32.xlu0 %v686_v60 }
 0x6ac   :  { %v689_v63 = vsel %vm54_vm0, %v664_v62, 0.0 }
 0x6af   :  { %v668_v3 = vpop.permute.xlu1 %667  ;;  %690 = vadd.xlane.f32.xlu0 %v689_v63 }
 0x6b0   :  { %v695_v4 = vsel %vm54_vm0, %v668_v3, 0.0 }
 0x6b3   :  { %v666_v5 = vpop.permute.xlu0 %665  ;;  %696 = vadd.xlane.f32.xlu0 %v695_v4 }
 0x6b4   :  { %v692_v6 = vsel %vm54_vm0, %v666_v5, 0.0 }
 0x6b5   :  { %693 = vadd.xlane.f32.xlu1 %v692_v6 }
 0x6b7   :  { %v670_v8 = vpop.permute.xlu0 %669 }
 0x6b8   :  { %v698_v13 = vsel %vm54_vm0, %v670_v8, 0.0  ;;  %v813_v8 = vand.u32 127, %v542_v9 }
 0x6b9   :  { %699 = vadd.xlane.f32.xlu1 %v698_v13 }
 0x6bb   :  { %v672_v15 = vpop.permute.xlu1 %671  ;;  %v674_v16 = vpop.permute.xlu0 %673 }
 0x6bc   :  { %v701_v18 = vsel %vm54_vm0, %v672_v15, 0.0  ;;  %v704_v22 = vsel %vm54_vm0, %v674_v16, 0.0  ;;  %v2095_v16 = vsub.s32 %v813_v8, %v1957_v11 }
 0x6bd   :  { %702 = vadd.xlane.f32.xlu0 %v701_v18  ;;  %705 = vadd.xlane.f32.xlu1 %v704_v22 }
 0x6bf   :  { %v728_v1 = vpop.permute.xlu1 %727  ;;  %v735_v28 = vpop.permute.xlu0 %734 }
 0x6c3   :  { %v742_v30 = vpop.permute.xlu1 %741  ;;  %v749_v31 = vpop.permute.xlu0 %748 }
 0x6ce   :  { %755 = vbcast.lane.b32.xlu1 %v753_v24, 256 }
 0x6d3   :  { %762 = vbcast.lane.b32.xlu0 %v760_v26, 256 }
 0x732   :  { %v685_v35 = vpop.xlane.xlu1 %684 }
 0x733   :  { %v2075_v36 = vadd.f32 %v714_v52, %v685_v35 }
 0x734   :  { %v688_v38 = vpop.xlane.xlu0 %687 }
 0x735   :  { %v2077_v39 = vadd.f32 %v721_v48, %v688_v38  ;;  %789 = vperm.xlu1 %1726, %v2075_v36  }
 0x737   :  { %792 = vperm.xlu0 %1727, %v2077_v39  }
 0x738   :  { %v691_v41 = vpop.xlane.xlu0 %690 }
 0x739   :  { %v774_v45 = vadd.f32 %v728_v1, %v691_v41 }
 0x73b   :  { %795 = vperm.xlu1 %1726, %v774_v45  }
 0x73c   :  { %v697_v46 = vpop.xlane.xlu0 %696 }
 0x73d   :  { %v2081_v53 = vadd.f32 %v742_v30, %v697_v46 }
 0x73e   :  { %v694_v55 = vpop.xlane.xlu1 %693 }
 0x73f   :  { %v775_v57 = vadd.f32 %v735_v28, %v694_v55  ;;  %801 = vperm.xlu0 %1727, %v2081_v53  }
 0x741   :  { %798 = vperm.xlu1 %1726, %v775_v57  }
 0x742   :  { %v700_v52 = vpop.xlane.xlu1 %699 }
 0x743   :  { %v2084_v60 = vadd.f32 %v749_v31, %v700_v52 }
 0x745   :  { %804 = vperm.xlu1 %1726, %v2084_v60  }
 0x746   :  { %v706_v48 = vpop.xlane.xlu1 %705  ;;  %v703_v62 = vpop.xlane.xlu0 %702 }
 0x74a   :  { %v756_v63 = vpop.permute.xlu1 %755  ;;  %v763_v3 = vpop.permute.xlu0 %762 }
 0x74b   :  { %v2087_v4 = vadd.f32 %v756_v63, %v703_v62  ;;  %v2089_v5 = vadd.f32 %v763_v3, %v706_v48 }
 0x74d   :  { %807 = vperm.xlu0 %1727, %v2087_v4   ;;  %810 = vperm.xlu1 %1726, %v2089_v5  }
 0x7b0   :  { %v790_v6 = vpop.permute.xlu1 %789 }
 0x7b1   :  { %v817_v24 = vrot.slane %v790_v6, %v2095_v16 }
 0x7b2   :  { %v793_v13 = vpop.permute.xlu0 %792 }
 0x7b3   :  { %v821_v18 = vrot.slane %v793_v13, %v2095_v16 }
 0x7b5   :  { %v847_v28 = vsel %vm846_vm10, %v821_v18, %v817_v24 }
 0x7b6   :  { %v796_v7 = vpop.permute.xlu1 %795 }
 0x7b7   :  { %v825_v22 = vrot.slane %v796_v7, %v2095_v16 }
 0x7b9   :  { %v849_v30 = vsel %vm848_vm11, %v825_v22, %v847_v28 }
 0x7ba   :  { %v802_v9 = vpop.permute.xlu0 %801 }
 0x7bb   :  { %v833_v35 = vrot.slane %v802_v9, %v2095_v16 }
 0x7bc   :  { %v799_v15 = vpop.permute.xlu1 %798 }
 0x7bd   :  { %v829_v26 = vrot.slane %v799_v15, %v2095_v16 }
 0x7bf   :  { %v851_v11 = vsel %vm850_vm12, %v829_v26, %v849_v30 }
 0x7c0   :  { %v805_v1 = vpop.permute.xlu1 %804  ;;  %v853_v46 = vsel %vm852_vm13, %v833_v35, %v851_v11 }
 0x7c1   :  { %v837_v31 = vrot.slane %v805_v1, %v2095_v16 }
 0x7c3   :  { %v855_v48 = vsel %vm854_vm14, %v837_v31, %v853_v46 }
 0x7c8   :  { %v811_v38 = vpop.permute.xlu1 %810  ;;  %v808_v41 = vpop.permute.xlu0 %807 }
 0x7c9   :  { %v845_v55 = vrot.slane %v811_v38, %v2095_v16  ;;  %v841_v52 = vrot.slane %v808_v41, %v2095_v16 }
 0x7cb   :  { %v857_v62 = vsel %vm856_vm15, %v841_v52, %v855_v48 }
 0x7cc   :  { %v859_v63 = vsel %vm858_vm1, %v845_v55, %v857_v62 }
 0x7cd   :  { %v862_v3 = vsel %vm861_vm2, %v859_v63, -inf }
 0x7ce   :  { %863 = vmax.xlane.f32.xlu0 %v862_v3 }
 0x857   :  { %v864_v6 = vpop.xlane.xlu0 %863 }
 0x858   :  { %v869_v7 = vrot.slane %v864_v6, %v1967_v19  ;;  %v873_v8 = vrot.slane %v864_v6, %v1991_v58  ;;  %v877_v13 = vrot.slane %v864_v6, %v2034_v33  ;;  %v881_v24 = vrot.slane %v864_v6, %v2037_v34 }
 0x859   :  { %v885_v28 = vrot.slane %v864_v6, %v2046_v40  ;;  %v889_v11 = vrot.slane %v864_v6, %v2051_v43  ;;  %v897_v41 = vrot.slane %v864_v6, %v2071_v25 }
 0x85a   :  { %v906_v15 = vsub.f32 %v2075_v36, %v869_v7  ;;  %v907_v18 = vsub.f32 %v2077_v39, %v873_v8  ;;  %v908_v26 = vsub.f32 %v774_v45, %v877_v13  ;;  %v909_v9 = vsub.f32 %v775_v57, %v881_v24 }
 0x85b   :  { %v910_v31 = vsub.f32 %v2081_v53, %v885_v28  ;;  %v893_v36 = vrot.slane %v864_v6, %v2066_v23  ;;  %v911_v39 = vsub.f32 %v2084_v60, %v889_v11  ;;  %v913_v53 = vsub.f32 %v2089_v5, %v897_v41 }
 0x85c   :  { %v914_v22 = vmul.f32 1.442695, %v906_v15  ;;  %v916_v1 = vmul.f32 1.442695, %v907_v18  ;;  %v918_v30 = vmul.f32 1.442695, %v908_v26 }
 0x85d   :  { %v920_v35 = vmul.f32 1.442695, %v909_v9  ;;  %v922_v38 = vmul.f32 1.442695, %v910_v31  ;;  %v912_v57 = vsub.f32 %v2087_v4, %v893_v36  ;;  %v924_v46 = vmul.f32 1.442695, %v911_v39 }
 0x85e   :  { %1761 = vpow2.f32 %v914_v22  ;;  %v928_v60 = vmul.f32 1.442695, %v913_v53 }
 0x85f   :  { %1763 = vpow2.f32 %v916_v1  ;;  %v926_v52 = vmul.f32 1.442695, %v912_v57 }
 0x860   :  { %1765 = vpow2.f32 %v918_v30 }
 0x861   :  { %1767 = vpow2.f32 %v920_v35 }
 0x862   :  { %1769 = vpow2.f32 %v922_v38 }
 0x863   :  { %1771 = vpow2.f32 %v924_v46 }
 0x864   :  { %1773 = vpow2.f32 %v926_v52 }
 0x865   :  { %1775 = vpow2.f32 %v928_v60 }
 0x86b   :  { %v1762_v45 = vpop.eup %1761 }
 0x86c   :  { %939 = vperm.xlu1 %1726, %v1762_v45   ;;  %v1764_v55 = vpop.eup %1763 }
 0x86d   :  { %v1766_v48 = vpop.eup %1765 }
 0x86e   :  { %v1768_v62 = vpop.eup %1767 }
 0x86f   :  { %v1770_v63 = vpop.eup %1769 }
 0x870   :  { %942 = vperm.xlu1 %1726, %v1764_v55   ;;  %v1772_v3 = vpop.eup %1771 }
 0x871   :  { %v1774_v4 = vpop.eup %1773 }
 0x872   :  { %v1776_v6 = vpop.eup %1775 }
 0x874   :  { %945 = vperm.xlu1 %1726, %v1766_v48  }
 0x878   :  { %948 = vperm.xlu1 %1726, %v1768_v62  }
 0x87c   :  { %951 = vperm.xlu1 %1726, %v1770_v63  }
 0x880   :  { %954 = vperm.xlu1 %1726, %v1772_v3  }
 0x884   :  { %957 = vperm.xlu1 %1726, %v1774_v4  }
 0x888   :  { %960 = vperm.xlu1 %1726, %v1776_v6  }
 0x8e7   :  { %v940_v7 = vpop.permute.xlu1 %939 }
 0x8e8   :  { %v965_v26 = vrot.slane %v940_v7, %v2095_v16 }
 0x8eb   :  { %v943_v8 = vpop.permute.xlu1 %942 }
 0x8ec   :  { %v969_v22 = vrot.slane %v943_v8, %v2095_v16 }
 0x8ee   :  { %v994_v30 = vsel %vm846_vm10, %v969_v22, %v965_v26 }
 0x8ef   :  { %v946_v5 = vpop.permute.xlu1 %945 }
 0x8f0   :  { %v973_v24 = vrot.slane %v946_v5, %v2095_v16 }
 0x8f2   :  { %v995_v31 = vsel %vm848_vm11, %v973_v24, %v994_v30 }
 0x8f3   :  { %v949_v13 = vpop.permute.xlu1 %948 }
 0x8f4   :  { %v977_v1 = vrot.slane %v949_v13, %v2095_v16 }
 0x8f6   :  { %v996_v36 = vsel %vm850_vm12, %v977_v1, %v995_v31 }
 0x8f7   :  { %v952_v15 = vpop.permute.xlu1 %951 }
 0x8f8   :  { %v981_v28 = vrot.slane %v952_v15, %v2095_v16 }
 0x8fa   :  { %v997_v39 = vsel %vm852_vm13, %v981_v28, %v996_v36 }
 0x8fb   :  { %v955_v18 = vpop.permute.xlu1 %954 }
 0x8fc   :  { %v985_v11 = vrot.slane %v955_v18, %v2095_v16 }
 0x8fe   :  { %v998_v41 = vsel %vm854_vm14, %v985_v11, %v997_v39 }
 0x8ff   :  { %v958_v9 = vpop.permute.xlu1 %957 }
 0x900   :  { %v989_v35 = vrot.slane %v958_v9, %v2095_v16 }
 0x902   :  { %v999_v46 = vsel %vm856_vm15, %v989_v35, %v998_v41 }
 0x903   :  { %v961_v38 = vpop.permute.xlu1 %960 }
 0x904   :  { %v993_v57 = vrot.slane %v961_v38, %v2095_v16  ;;  %v1288_v38 = vsel %vm54_vm0, %v1943_v61, 0.0  ;;  %v1295_v61 = vsel %vm54_vm0, %v1948_v2, 0.0 }
 0x906   :  { %v1000_v53 = vsel %vm858_vm1, %v993_v57, %v999_v46 }
 0x907   :  { %v1002_v52 = vsel %vm861_vm2, %v1000_v53, 0.0 }
 0x908   :  { %1003 = vadd.xlane.f32.xlu0 %v1002_v52 }
 0x991   :  { %v1004_v60 = vpop.xlane.xlu0 %1003 }
 0x992   :  { %1777 = vrcp.f32 %v1004_v60 }
 0x99f   :  { %v1778_v7 = vpop.eup %1777 }
 0x9a0   :  { %v1014_v8 = vrot.slane %v1778_v7, %v1991_v58  ;;  %v1010_v5 = vrot.slane %v1778_v7, %v1967_v19  ;;  %v1018_v18 = vrot.slane %v1778_v7, %v2034_v33  ;;  %v1022_v22 = vrot.slane %v1778_v7, %v2037_v34 }
 0x9a1   :  { %v1026_v26 = vrot.slane %v1778_v7, %v2046_v40  ;;  %v1030_v19 = vrot.slane %v1778_v7, %v2051_v43  ;;  %v1034_v33 = vrot.slane %v1778_v7, %v2066_v23  ;;  %v1246_v40 = vsel %vm54_vm0, %v1916_v44, 0.0 }
 0x9a2   :  { %v1048_v13 = vmul.f32 %v1764_v55, %v1014_v8  ;;  %v1047_v15 = vmul.f32 %v1762_v45, %v1010_v5  ;;  %v1049_v16 = vmul.f32 %v1766_v48, %v1018_v18  ;;  %v1050_v24 = vmul.f32 %v1768_v62, %v1022_v22 }
 0x9a3   :  { %v1051_v58 = vmul.f32 %v1770_v63, %v1026_v26  ;;  %v1052_v45 = vmul.f32 %v1772_v3, %v1030_v19  ;;  %v1053_v55 = vmul.f32 %v1774_v4, %v1034_v33  ;;  %v1038_v48 = vrot.slane %v1778_v7, %v2071_v25 }
 0x9a4   :  { %1062 = vperm.xlu0 %1727, %v1048_v13   ;;  %1057 = vperm.xlu1 %1726, %v1047_v15   ;;  %v1247_v43 = vrot.slane %v1246_v40, 4  ;;  %v1253_v23 = vsel %vm54_vm0, %v1921_v47, 0.0  ;;  %v1289_v7 = vrot.slane %v1288_v38, 4 }
 0x9a5   :  { %v1054_v34 = vmul.f32 %v1776_v6, %v1038_v48  ;;  %v1254_v63 = vrot.slane %v1253_v23, 4  ;;  %v1296_v48 = vrot.slane %v1295_v61, 4 }
 0x9a6   :  { %v1248_v25 = vadd.f32 %v1247_v43, %v1246_v40 }
 0x9a7   :  { %v1255_v30 = vadd.f32 %v1254_v63, %v1253_v23 }
 0x9a8   :  { %1067 = vperm.xlu1 %1726, %v1049_v16   ;;  %1196 = vrot.lane.b32.xlu0 %v1853_v49, %s1783_s27  ;;  %v1788_v49 = vmov 8  }
 0x9ac   :  { %1072 = vperm.xlu1 %1726, %v1050_v24  }
 0x9b0   :  { %1077 = vperm.xlu1 %1726, %v1051_v58  }
 0x9b4   :  { %1082 = vperm.xlu1 %1726, %v1052_v45  }
 0x9b8   :  { %1087 = vperm.xlu1 %1726, %v1053_v55   ;;  %v1290_v55 = vadd.f32 %v1289_v7, %v1288_v38 }
 0x9bc   :  { %1092 = vperm.xlu1 %1726, %v1054_v34  }
 0x9c0   :  { %1194 = vrot.lane.b32.xlu1 %v1860_v50, %s1783_s27 }
 0x9c1   :  { %1728 = vset.pattern.permute.xlu1 %v1788_v49 }
 0x9c4   :  { %1303 = vperm.xlu1 %1728, %v1979_v37   ;;  %v1260_v37 = vsel %vm54_vm0, %v1925_v51, 0.0  ;;  %v1267_v51 = vsel %vm54_vm0, %v1930_v54, 0.0 }
 0x9c5   :  { %v1261_v4 = vrot.slane %v1260_v37, 4  ;;  %v1268_v41 = vrot.slane %v1267_v51, 4 }
 0x9c7   :  { %v1262_v39 = vadd.f32 %v1261_v4, %v1260_v37  ;;  %v1269_v16 = vadd.f32 %v1268_v41, %v1267_v51  ;;  %v1291_v4 = vrot.slane %v1290_v55, 2 }
 0x9c8   :  { %1329 = vrot.lane.b32.xlu1 %v1914_v42, %s1781_s19 }
 0x9c9   :  { %v1263_v15 = vrot.slane %v1262_v39, 2 }
 0x9cb   :  { %v1264_v23 = vadd.f32 %v1263_v15, %v1262_v39  ;;  %v1292_v39 = vadd.f32 %v1291_v4, %v1290_v55 }
 0x9cc   :  { %1410 = vrot.lane.b32.xlu1 %v1962_v12, %s1782_s20 }
 0x9d0   :  { %1473 = vrot.lane.b32.xlu1 %v1860_v50, %s1782_s20  ;;  %v1249_v50 = vrot.slane %v1248_v25, 2 }
 0x9d2   :  { %v1250_v36 = vadd.f32 %v1249_v50, %v1248_v25  ;;  %v1270_v25 = vrot.slane %v1269_v16, 2 }
 0x9d4   :  { %v1251_v13 = vrot.slane %v1250_v36, 1  ;;  %v1271_v51 = vadd.f32 %v1270_v25, %v1269_v16 }
 0x9d6   :  { %v2190_v40 = vadd.f32 %v1251_v13, %v1250_v36 }
 0xa1f   :  { %v1063_v62 = vpop.permute.xlu0 %1062  ;;  %v1058_v42 = vpop.permute.xlu1 %1057 }
 0xa20   :  { %v1096_v12 = vmul.f32 %v1063_v62, %v2001_v14  ;;  %v1095_v3 = vmul.f32 %v1058_v42, %v1998_v10  ;;  %v1274_v10 = vsel %vm54_vm0, %v1934_v56, 0.0  ;;  %v1281_v14 = vsel %vm54_vm0, %v1939_v59, 0.0 }
 0xa21   :  { %v1256_v56 = vrot.slane %v1255_v30, 2  ;;  %v1275_v52 = vrot.slane %v1274_v10, 4  ;;  %v1282_v60 = vrot.slane %v1281_v14, 4 }
 0xa22   :  { %v1111_v44 = vsel %vm1103_vm3, %v1096_v12, 0.0  ;;  %v1104_v6 = vsel %vm1103_vm3, %v1095_v3, 0.0 }
 0xa23   :  { %v1112_v1 = vrot.slane %v1111_v44, 4  ;;  %v1105_v47 = vrot.slane %v1104_v6, 4  ;;  %v1068_v28 = vpop.permute.xlu1 %1067  ;;  %v1197_v9 = vpop.permute.xlu0 %1196  ;;  %v2187_v19 = vadd.f32 %v1256_v56, %v1255_v30  ;;  %v1276_v45 = vadd.f32 %v1275_v52, %v1274_v10 }
 0xa24   :  { %v1097_v11 = vmul.f32 %v1068_v28, %v2005_v17  ;;  %1686 = vmatpush3.bf16.msra.mxu1 %v1197_v9  ;;  %v1283_v33 = vadd.f32 %v1282_v60, %v1281_v14  ;;  %v1265_v30 = vrot.slane %v1264_v23, 1  ;;  %v1272_v56 = vrot.slane %v1271_v51, 1 }
 0xa25   :  { %v1113_v31 = vadd.f32 %v1112_v1, %v1111_v44  ;;  %v1106_v35 = vadd.f32 %v1105_v47, %v1104_v6  ;;  %1687 = vmatprep.subr.bf16.mxu1 %v1784_v20  ;;  %v1277_v63 = vrot.slane %v1276_v45, 2  ;;  %v1297_v44 = vadd.f32 %v1296_v48, %v1295_v61 }
 0xa26   :  { %v1118_v54 = vsel %vm1103_vm3, %v1097_v11, 0.0  ;;  %v1284_v12 = vrot.slane %v1283_v33, 2 }
 0xa27   :  { %v1114_v17 = vrot.slane %v1113_v31, 2  ;;  %v1107_v57 = vrot.slane %v1106_v35, 2  ;;  %v1119_v46 = vrot.slane %v1118_v54, 4  ;;  %v1073_v53 = vpop.permute.xlu1 %1072  ;;  %v1298_v38 = vrot.slane %v1297_v44, 2 }
 0xa28   :  { %v1098_v59 = vmul.f32 %v1073_v53, %v2017_v0 }
 0xa29   :  { %v1115_v8 = vadd.f32 %v1114_v17, %v1113_v31  ;;  %v1120_v5 = vadd.f32 %v1119_v46, %v1118_v54  ;;  %v1108_v22 = vadd.f32 %v1107_v57, %v1106_v35  ;;  %v1278_v31 = vadd.f32 %v1277_v63, %v1276_v45 }
 0xa2a   :  { %v1125_v18 = vsel %vm1103_vm3, %v1098_v59, 0.0  ;;  %v1285_v35 = vadd.f32 %v1284_v12, %v1283_v33  ;;  %v1299_v61 = vadd.f32 %v1298_v38, %v1297_v44 }
 0xa2b   :  { %v1121_v24 = vrot.slane %v1120_v5, 2  ;;  %v1126_v26 = vrot.slane %v1125_v18, 4  ;;  %v1078_v58 = vpop.permute.xlu1 %1077  ;;  %v1116_v34 = vrot.slane %v1115_v8, 1  ;;  %v1109_v37 = vrot.slane %v1108_v22, 1 }
 0xa2c   :  { %v1099_v0 = vmul.f32 %v1078_v58, %v2012_v21  ;;  %v1258_v21 = vrot.slane %v2187_v19, 1  ;;  %v1300_v63 = vrot.slane %v1299_v61, 1 }
 0xa2d   :  { %v1127_v49 = vadd.f32 %v1126_v26, %v1125_v18  ;;  %v1122_v2 = vadd.f32 %v1121_v24, %v1120_v5  ;;  %v1117_v6 = vadd.f32 %v1116_v34, %v1115_v8  ;;  %v1110_v11 = vadd.f32 %v1109_v37, %v1108_v22 }
 0xa2e   :  { %v1132_v43 = vsel %vm1103_vm3, %v1099_v0, 0.0  ;;  %v1279_v8 = vrot.slane %v1278_v31, 1  ;;  %v1286_v5 = vrot.slane %v1285_v35, 1  ;;  %v1259_v34 = vadd.f32 %v1258_v21, %v2187_v19 }
 0xa2f   :  { %v1128_v62 = vrot.slane %v1127_v49, 2  ;;  %v1083_v42 = vpop.permute.xlu1 %1082  ;;  %v1133_v3 = vrot.slane %v1132_v43, 4  ;;  %v1123_v1 = vrot.slane %v1122_v2, 1  ;;  %v1161_v54 = vpack.c.bf16 %v1117_v6, %v1117_v6 }
 0xa30   :  { %v1100_v50 = vmul.f32 %v1083_v42, %v2022_v27  ;;  %v1160_v52 = vpack.c.bf16 %v1110_v11, %v1110_v11  ;;  %v1287_v42 = vadd.f32 %v1286_v5, %v1285_v35  ;;  %v1301_v11 = vadd.f32 %v1300_v63, %v1299_v61  ;;  %v1743_v63 = vld [vmem:[%s2277_s1 + $0x8] sm:$0xff]  }
 0xa31   :  { %v1129_v47 = vadd.f32 %v1128_v62, %v1127_v49  ;;  %v1134_v28 = vadd.f32 %v1133_v3, %v1132_v43  ;;  %v1124_v17 = vadd.f32 %v1123_v1, %v1122_v2  ;;  %v1177_v22 = vunpack.c.l.b16 %v1161_v54 }
 0xa32   :  { %v1139_v9 = vsel %vm1103_vm3, %v1100_v50, 0.0  ;;  %v1176_v45 = vunpack.c.l.b16 %v1160_v52  ;;  %v1266_v49 = vadd.f32 %v1265_v30, %v1264_v23  ;;  %v1273_v2 = vadd.f32 %v1272_v56, %v1271_v51 }
 0xa33   :  { %v1140_v10 = vrot.slane %v1139_v9, 4  ;;  %v1088_v14 = vpop.permute.xlu1 %1087  ;;  %v1135_v36 = vrot.slane %v1134_v28, 2  ;;  %v1130_v57 = vrot.slane %v1129_v47, 1  ;;  %v1162_v24 = vpack.c.bf16 %v1124_v17, %v1124_v17 }
 0xa34   :  { %v1101_v27 = vmul.f32 %v1088_v14, %v2030_v32  ;;  %v1293_v32 = vrot.slane %v1292_v39, 1  ;;  %v1184_v4 = vsel %vm846_vm10, %v1177_v22, %v1176_v45 }
 0xa35   :  { %v1141_v41 = vadd.f32 %v1140_v10, %v1139_v9  ;;  %v1136_v46 = vadd.f32 %v1135_v36, %v1134_v28  ;;  %v1131_v26 = vadd.f32 %v1130_v57, %v1129_v47  ;;  %v1178_v12 = vunpack.c.l.b16 %v1162_v24 }
 0xa36   :  { %v1146_v53 = vsel %vm1103_vm3, %v1101_v27, 0.0  ;;  %v1294_v50 = vadd.f32 %v1293_v32, %v1292_v39 }
 0xa37   :  { %v1142_v60 = vrot.slane %v1141_v41, 2  ;;  %v1147_v59 = vrot.slane %v1146_v53, 4  ;;  %v1093_v7 = vpop.permute.xlu1 %1092  ;;  %v1137_v13 = vrot.slane %v1136_v46, 1  ;;  %v1163_v3 = vpack.c.bf16 %v1131_v26, %v1131_v26  ;;  %v1739_v26 = vld [vmem:[%s2277_s1 + $0x28] sm:$0xff]  }
 0xa38   :  { %v1102_v15 = vmul.f32 %v1093_v7, %v2026_v29  ;;  %v1280_v29 = vadd.f32 %v1279_v8, %v1278_v31  ;;  %v1185_v10 = vsel %vm848_vm11, %v1178_v12, %v1184_v4  ;;  %1694 = vmatpush3.bf16.msra.mxu0 %v1739_v26  ;;  %v1780_v12 = vld [vmem:[%s2274_s0 + $0x14] ss:$8 sps:$4 sm:$0xff]  }
 0xa39   :  { %v1143_v18 = vadd.f32 %v1142_v60, %v1141_v41  ;;  %v1148_v16 = vadd.f32 %v1147_v59, %v1146_v53  ;;  %v1138_v43 = vadd.f32 %v1137_v13, %v1136_v46  ;;  %v1179_v14 = vunpack.c.l.b16 %v1163_v3  ;;  %1695 = vmatprep.subr.bf16.mxu0 %v1784_v20 }
 0xa3a   :  { %v1153_v58 = vsel %vm1103_vm3, %v1102_v15, 0.0 }
 0xa3b   :  { %v1144_v33 = vrot.slane %v1143_v18, 1  ;;  %v1149_v0 = vrot.slane %v1148_v16, 2  ;;  %v1154_v55 = vrot.slane %v1153_v58, 4  ;;  %v1195_v48 = vpop.permute.xlu1 %1194  ;;  %v1164_v23 = vpack.c.bf16 %v1138_v43, %v1138_v43 }
 0xa3c   :  { %1688 = vmatpush3.bf16.msra.mxu1 %v1195_v48  ;;  %v1186_v8 = vsel %vm850_vm12, %v1179_v14, %v1185_v10 }
 0xa3d   :  { %v1145_v25 = vadd.f32 %v1144_v33, %v1143_v18  ;;  %v1150_v37 = vadd.f32 %v1149_v0, %v1148_v16  ;;  %v1155_v62 = vadd.f32 %v1154_v55, %v1153_v58  ;;  %1709 = vmatprep.subr.bf16.mxu1 %v1784_v20  ;;  %v1180_v38 = vunpack.c.l.b16 %v1164_v23 }
 0xa3f   :  { %v1151_v44 = vrot.slane %v1150_v37, 1  ;;  %v1156_v6 = vrot.slane %v1155_v62, 2  ;;  %v1304_v19 = vpop.permute.xlu1 %1303  ;;  %v1165_v28 = vpack.c.bf16 %v1145_v25, %v1145_v25  ;;  %v1187_v15 = vsel %vm852_vm13, %v1180_v38, %v1186_v8 }
 0xa40   :  { %v1305_v21 = vrot.slane %v1304_v19, 1  ;;  %v1306_v1 = vrot.slane %v1304_v19, 2  ;;  %v1307_v47 = vrot.slane %v1304_v19, 3  ;;  %v1308_v51 = vrot.slane %v1304_v19, 4 }
 0xa41   :  { %v1152_v9 = vadd.f32 %v1151_v44, %v1150_v37  ;;  %v1157_v30 = vadd.f32 %v1156_v6, %v1155_v62  ;;  %v1309_v31 = vrot.slane %v1304_v19, 5  ;;  %v1310_v27 = vrot.slane %v1304_v19, 6  ;;  %v1741_v37 = vld [vmem:[%s2277_s1 + $0x18] sm:$0xff]   ;;  %v1779_v62 = vld [vmem:[%s2275_s3 + $0x8] ss:$0 sm:$0xff] }
 0xa42   :  { %v1321_v39 = vmul.f32 %v1305_v21, %v1259_v34  ;;  %v1311_v54 = vrot.slane %v1304_v19, 7  ;;  %v1322_v41 = vmul.f32 %v1306_v1, %v1266_v49  ;;  %v1323_v17 = vmul.f32 %v1307_v47, %v1273_v2  ;;  %v1740_v34 = vld [vmem:[%s2277_s1 + $0x20] sm:$0xff]  }
 0xa43   :  { %v1166_v35 = vpack.c.bf16 %v1152_v9, %v1152_v9  ;;  %v1158_v36 = vrot.slane %v1157_v30, 1  ;;  %v1181_v57 = vunpack.c.l.b16 %v1165_v28  ;;  %v1320_v53 = vmul.f32 %v1304_v19, %v2190_v40  ;;  %1696 = vmatpush3.bf16.msra.mxu0 %v1740_v34  ;;  %v1330_v19 = vpop.permute.xlu1 %1329 }
 0xa44   :  { %v1324_v56 = vmul.f32 %v1308_v51, %v1280_v29  ;;  %v1325_v60 = vmul.f32 %v1309_v31, %v1287_v42  ;;  %v1340_v59 = vrot.slane %v1321_v39, 7  ;;  %v1342_v7 = vrot.slane %v1322_v41, 6  ;;  %1697 = vmatprep.subr.bf16.mxu0 %v1784_v20  ;;  %v1742_v42 = vld [vmem:[%s2277_s1 + $0x10] sm:$0xff]  }
 0xa45   :  { %v1159_v46 = vadd.f32 %v1158_v36, %v1157_v30  ;;  %v1182_v52 = vunpack.c.l.b16 %v1166_v35  ;;  %v1326_v13 = vmul.f32 %v1310_v27, %v1294_v50  ;;  %v1327_v32 = vmul.f32 %v1311_v54, %v1301_v11  ;;  %v1744_v50 = vld [vmem:[%s2277_s1] sm:$0xff]   ;;  %v1572_v27 = vld [vmem:[%s2275_s3 + $0xa] ss:$0 sm:$0xff] }
 0xa46   :  { %v1341_v61 = vsel %vm846_vm10, %v1340_v59, %v1320_v53  ;;  %v1344_v18 = vrot.slane %v1323_v17, 5  ;;  %v1188_v22 = vsel %vm854_vm14, %v1181_v57, %v1187_v15  ;;  %v1346_v24 = vrot.slane %v1324_v56, 4 }
 0xa47   :  { %v1167_v5 = vpack.c.bf16 %v1159_v46, %v1159_v46  ;;  %v1343_v40 = vsel %vm848_vm11, %v1342_v7, %v1341_v61  ;;  %v1189_v58 = vsel %vm856_vm15, %v1182_v52, %v1188_v22  ;;  %v1348_v33 = vrot.slane %v1325_v60, 3  ;;  %1698 = vmatpush3.bf16.msra.mxu0 %v1741_v37  ;;  %v1411_v51 = vpop.permute.xlu1 %1410 }
 0xa48   :  { %v1345_v45 = vsel %vm850_vm12, %v1344_v18, %v1343_v40  ;;  %v1350_v48 = vrot.slane %v1326_v13, 2  ;;  %v1352_v43 = vrot.slane %v1327_v32, 1  ;;  %1699 = vmatprep.subr.bf16.mxu0 %v1784_v20  ;;  %v1789_v46 = vmov 32  }
 0xa49   :  { %v1183_v16 = vunpack.c.l.b16 %v1167_v5  ;;  %v1347_v55 = vsel %vm852_vm13, %v1346_v24, %v1345_v45  ;;  %1729 = vset.pattern.permute.xlu0 %v1789_v46 }
 0xa4a   :  { %v1349_v2 = vsel %vm854_vm14, %v1348_v33, %v1347_v55 }
 0xa4b   :  { %v1190_v0 = vsel %vm858_vm1, %v1183_v16, %v1189_v58  ;;  %v1351_v29 = vsel %vm856_vm15, %v1350_v48, %v1349_v2  ;;  %1700 = vmatpush3.bf16.msra.mxu0 %v1742_v42  ;;  %v1474_v10 = vpop.permute.xlu1 %1473 }
 0xa4c   :  { %v1191_v49 = vpack.c.b16 %v1190_v0, %v1190_v0  ;;  %v1353_v25 = vsel %vm858_vm1, %v1352_v43, %v1351_v29  ;;  %1701 = vmatprep.subr.bf16.mxu0 %v1784_v20 }
 0xa4e   :  { %1192 = vrot.lane.b32.xlu0 %v1191_v49, %s1783_s27 }
 0xa4f   :  { %1702 = vmatpush3.bf16.msra.mxu0 %v1743_v63 }
 0xa50   :  { %1703 = vmatprep.subr.bf16.mxu0 %v1784_v20 }
 0xa52   :  { %1200 = vrot.lane.b32.xlu0 %v1779_v62, %s1782_s20 }
 0xa53   :  { %1704 = vmatpush3.bf16.msra.mxu0 %v1744_v50 }
 0xa56   :  { %1354 = vrot.lane.b32.xlu0 %v1353_v25, %s1782_s20 }
 0xa5a   :  { %1475 = vrot.lane.b32.xlu0 %v1780_v12, %s1782_s20 }
 0xac0   :  { %v1193_v3 = vpop.permute.xlu0 %1192 }
 0xac1   :  { %1690 = vmatmul.mubr.msk.bf16.vlgmr.msra.gmra.mxu1 %vm54_vm0, %v1193_v3 }
 0xac2   :  { %1713 = vmatprep.mubr.msk.bf16.mxu1 %vm1785_vm9, %v1784_v20 }
 0xac4   :  { %v1201_v4 = vpop.permute.xlu0 %1200 }
 0xac8   :  { %v1355_v21 = vpop.permute.xlu0 %1354 }
 0xacc   :  { %v1476_v11 = vpop.permute.xlu0 %1475 }
 0xacd   :  { %1710 = vmatpush3.bf16.msra.mxu1 %v1476_v11 }
 0xace   :  { %1711 = vmatprep.subr.bf16.mxu1 %v1784_v20 }
 0xad1   :  { %1712 = vmatpush3.bf16.msra.mxu1 %v1474_v10 }
 0xb81   :  { %v1240_v44 = vpop.f32.mrf.mxu1 }
 0xb82   :  { %v1241_v6 = vadd.f32 %v1240_v44, %v1201_v4 }
 0xb83   :  { %v1691_v23 = vpop.f32.mrf.mxu1 }
 0xb84   :  { %v1357_v1 = vsel %vm54_vm0, %v1241_v6, %v1330_v19 }
 0xb85   :  { %v1359_v47 = vsel %vm1358_vm4, %v1357_v1, %v1355_v21  ;;  %v1243_v28 = vpop.f32.mrf.mxu1 }
 0xb86   :  { %v1360_v9 = vpack.c.bf16 %v1359_v47, %v1359_v47 }
 0xb87   :  { %v1692_v30 = vpop.f32.mrf.mxu1 }
 0xb88   :  { %1706 = vmatmul.mubr.msk.bf16.vlgmr.msra.gmra.mxu0 %vm1413_vm5, %v1360_v9 }
 0xc48   :  { %v1451_v14 = vpop.f32.mrf.mxu0 }
 0xc49   :  { %v1452_v31 = vadd.f32 %v1451_v14, %v1411_v51 }
 0xc4a   :  { %v1707_v35 = vpop.f32.mrf.mxu0 }
 0xc4b   :  { %vm1457_vm6 = vcmp.ge.f32.partialorder %v1452_v31, 0.0  ;;  %v1458_v36 = vmul.f32 0.01, %v1452_v31 }
 0xc4c   :  { %v1454_v39 = vpop.f32.mrf.mxu0 }
 0xc4d   :  { %v1459_v38 = vsel %vm1457_vm6, %v1452_v31, %v1458_v36 }
 0xc4e   :  { %v1708_v54 = vpop.f32.mrf.mxu0  ;;  %v1469_v41 = vpack.c.bf16 %v1459_v38, %v1459_v38  ;;  %v1464_v17 = vmul.f32 %v1572_v27, %v1459_v38 }
 0xc50   :  { %1471 = vrot.lane.b32.xlu0 %v1469_v41, %s1783_s27  ;;  %v1465_v57 = vsel %vm54_vm0, %v1464_v17, 0.0 }
 0xc51   :  { %1466 = vadd.xlane.f32.xlu1 %v1465_v57 }
 0xcc2   :  { %v1472_v53 = vpop.permute.xlu0 %1471 }
 0xcc3   :  { %1714 = vmatmul.mubr.msk.bf16.vlgmr.msra.gmra.mxu1 %vm54_vm0, %v1472_v53 }
 0xcda   :  { %v1467_v56 = vpop.xlane.xlu1 %1466 }
 0xcdb   :  { %v1468_v52 = vadd.f32 %v1572_v27, %v1467_v56 }
 0xcdd   :  { %1529 = vperm.xlu0 %1729, %v1468_v52  }
 0xce1   :  { %1479 = vrot.lane.b32.xlu0 %v1779_v62, %s1781_s19 }
 0xd58   :  { %v1530_v60 = vpop.permute.xlu0 %1529 }
 0xd5c   :  { %v1480_v59 = vpop.permute.xlu0 %1479 }
 0xd83   :  { %v1519_v7 = vpop.f32.mrf.mxu1 }
 0xd84   :  { %v1520_v8 = vadd.f32 %v1519_v7, %v1480_v59 }
 0xd85   :  { %v1715_v5 = vpop.f32.mrf.mxu1 }
 0xd86   :  { %1526 = vst.msk [vmem:[%s2278_s4] sm:$0xff] %vm54_vm0, %v1520_v8 }
 0xd87   :  { %1532 = vst.msk [vmem:[%s2278_s4] sm:$0xff] %vm1103_vm3, %v1530_v60  ;;  %v1522_v13 = vpop.f32.mrf.mxu1 }
 0xd89   :  { %v1716_v15 = vpop.f32.mrf.mxu1 }

</bundles_post_ra>
